<compile_context>
chip_gen: v7x
topology: tpu7x:2x2x1
jax: 0.10.0
libtpu: 0.0.40
codegen_flags: <defaults>
</compile_context>

<pallas_src>
import functools

import jax
import jax.numpy as jnp
from jax.experimental import pallas as pl
from jax.experimental.pallas import tpu as pltpu

NUM_TERMS = 6   # curvature, lateral_jerk, velocity, collision, raceline, prediction
V_REF = 10.0    # reference velocity for the velocity cost term


def _round_up(x, m):
    return ((x + m - 1) // m) * m


def _linear_cost_kernel(theta_ref, traj_ref, cost_ref, terms_ref):
    """Computes per-trajectory cost terms and their theta-weighted sum.

    theta_ref : SMEM  (NUM_TERMS,)            f32   linear weights
    traj_ref  : VMEM  (NUM_TERMS, T, TB)      f32   channel-major, batch on lanes
    cost_ref  : VMEM  (1, TB)                 f32   total linear cost (lane dense)
    terms_ref : VMEM  (NUM_TERMS, TB)         f32   individual cost terms
    """
    curvature = traj_ref[0]                   # (T, TB)  dense leading-axis slices
    lat_acc   = traj_ref[1]
    velocity  = traj_ref[2]
    obst_d    = traj_ref[3]
    raceline  = traj_ref[4]
    pred_d    = traj_ref[5]

    # _curvature_cost: sum of squared curvature (sublane reduce over T).
    curv_cost = jnp.sum(curvature * curvature, axis=0, keepdims=True)      # (1, TB)

    # _lateral_jerk_cost: sum of squared finite differences of lateral accel.
    # XLU sublane rotate by +1 (non-negative shift) gives x[i-1]; mask row 0.
    lat_prev = pltpu.roll(lat_acc, shift=1, axis=0)                        # (T, TB)
    row = jax.lax.broadcasted_iota(jnp.int32, lat_acc.shape, 0)
    jerk = jnp.where(row >= 1, lat_acc - lat_prev, 0.0)
    jerk_cost = jnp.sum(jerk * jerk, axis=0, keepdims=True)                # (1, TB)

    # _velocity_cost: squared deviation from reference velocity.
    dv = velocity - V_REF
    vel_cost = jnp.sum(dv * dv, axis=0, keepdims=True)                     # (1, TB)

    # _collision_cost: exponential penalty on obstacle distance (EUP).
    coll_cost = jnp.sum(jnp.exp(-obst_d), axis=0, keepdims=True)           # (1, TB)

    # _raceline_cost: squared lateral offset from the raceline.
    race_cost = jnp.sum(raceline * raceline, axis=0, keepdims=True)        # (1, TB)

    # _prediction_cost: exponential penalty on predicted-agent distance.
    pred_cost = jnp.sum(jnp.exp(-pred_d), axis=0, keepdims=True)           # (1, TB)

    # _cost_terms: sublane-stack the six lane-dense rows -> (NUM_TERMS, TB).
    terms_ref[...] = jnp.concatenate(
        [curv_cost, jerk_cost, vel_cost, coll_cost, race_cost, pred_cost],
        axis=0,
    )

    # _calc_costs: linear combination with theta (scalar weights from SMEM).
    cost_ref[...] = (theta_ref[0] * curv_cost +
                     theta_ref[1] * jerk_cost +
                     theta_ref[2] * vel_cost +
                     theta_ref[3] * coll_cost +
                     theta_ref[4] * race_cost +
                     theta_ref[5] * pred_cost)                             # (1, TB)


@functools.partial(jax.jit, static_argnames=("batch_tile",))
def linear_cost(theta, traj, *, batch_tile=256):
    """theta: (NUM_TERMS,) f32; traj: (B, NUM_TERMS, T) f32
       -> (cost (B,) f32, terms (B, NUM_TERMS) f32)."""
    B, C, T = traj.shape
    assert C == NUM_TERMS

    # Lane-aligned batch tile; pad B up to a multiple of it (padded columns are
    # discarded after the kernel).
    bt = _round_up(max(128, min(batch_tile, _round_up(B, 128))), 128)
    Bp = _round_up(B, bt)

    # One XLA transpose to channel-major, batch-on-lanes layout (C, T, B).
    traj_cm = jnp.transpose(traj.astype(jnp.float32), (1, 2, 0))
    if Bp != B:
        traj_cm = jnp.pad(traj_cm, ((0, 0), (0, 0), (0, Bp - B)))

    cost_est = pl.CostEstimate(
        flops=6 * Bp * NUM_TERMS * T,
        transcendentals=2 * Bp * T,
        bytes_accessed=4 * (Bp * NUM_TERMS * T + Bp * (NUM_TERMS + 1) + NUM_TERMS),
    )

    cost_row, terms_cm = pl.pallas_call(
        _linear_cost_kernel,
        out_shape=(
            jax.ShapeDtypeStruct((1, Bp), jnp.float32),
            jax.ShapeDtypeStruct((NUM_TERMS, Bp), jnp.float32),
        ),
        grid_spec=pltpu.PrefetchScalarGridSpec(
            num_scalar_prefetch=0,
            grid=(Bp // bt,),
            in_specs=[
                # theta: whole vector resident in SMEM (scalar weights).
                pl.BlockSpec(memory_space=pltpu.MemorySpace.SMEM),
                # trajectories: all channels, full horizon, one batch tile.
                pl.BlockSpec((NUM_TERMS, T, bt), lambda i: (0, 0, i)),
            ],
            out_specs=[
                pl.BlockSpec((1, bt), lambda i: (0, i)),
                pl.BlockSpec((NUM_TERMS, bt), lambda i: (0, i)),
            ],
        ),
        compiler_params=pltpu.CompilerParams(
            dimension_semantics=("parallel",),
        ),
        cost_estimate=cost_est,
    )(theta.astype(jnp.float32), traj_cm)

    cost = cost_row[0, :B]
    terms = terms_cm[:, :B].T
    return cost, terms


def _linear_cost_reference(theta, traj):
    """Pure-JAX reference used for correctness checking."""
    curvature = traj[:, 0, :]
    lat_acc   = traj[:, 1, :]
    velocity  = traj[:, 2, :]
    obst_d    = traj[:, 3, :]
    raceline  = traj[:, 4, :]
    pred_d    = traj[:, 5, :]

    curv = jnp.sum(curvature ** 2, axis=-1)
    jerk = lat_acc[:, 1:] - lat_acc[:, :-1]
    jerk_c = jnp.sum(jerk ** 2, axis=-1)
    vel_c = jnp.sum((velocity - V_REF) ** 2, axis=-1)
    coll = jnp.sum(jnp.exp(-obst_d), axis=-1)
    race = jnp.sum(raceline ** 2, axis=-1)
    pred = jnp.sum(jnp.exp(-pred_d), axis=-1)

    terms = jnp.stack([curv, jerk_c, vel_c, coll, race, pred], axis=-1)
    return terms @ theta, terms


def _make_inputs(key, B, T):
    k_theta, k_traj = jax.random.split(key)
    theta = jax.random.uniform(k_theta, (NUM_TERMS,), jnp.float32,
                               minval=0.1, maxval=1.0)
    traj = jax.random.normal(k_traj, (B, NUM_TERMS, T), jnp.float32)
    # Distance-like channels (obstacle / prediction) must be non-negative.
    traj = traj.at[:, 3, :].set(jnp.abs(traj[:, 3, :]) + 0.5)
    traj = traj.at[:, 5, :].set(jnp.abs(traj[:, 5, :]) + 0.5)
    # Velocity channel around the reference velocity.
    traj = traj.at[:, 2, :].set(V_REF + traj[:, 2, :])
    return theta, traj


if __name__ == "__main__":
    key = jax.random.PRNGKey(0)

    # Main case: 512 candidate trajectories, 128 steps -> grid of 2 batch tiles.
    theta, traj = _make_inputs(key, B=512, T=128)
    cost, terms = linear_cost(theta, traj)
    jax.block_until_ready((cost, terms))

    cost_ref, terms_ref = _linear_cost_reference(theta, traj)
    assert jnp.allclose(cost, cost_ref, rtol=1e-4, atol=1e-4)
    assert jnp.allclose(terms, terms_ref, rtol=1e-4, atol=1e-4)

    # Ragged-batch case: exercises the padding path (B not a multiple of 128).
    theta_s, traj_s = _make_inputs(jax.random.PRNGKey(1), B=100, T=128)
    cost_s, terms_s = linear_cost(theta_s, traj_s)
    jax.block_until_ready((cost_s, terms_s))
    cost_sr, terms_sr = _linear_cost_reference(theta_s, traj_s)
    assert jnp.allclose(cost_s, cost_sr, rtol=1e-4, atol=1e-4)
    assert jnp.allclose(terms_s, terms_sr, rtol=1e-4, atol=1e-4)

    print("KERNEL_OK")
</pallas_src>

<mosaic_0001>
module attributes {stable_mosaic.version = 11 : i64} {
  func.func @_linear_cost_kernel(%arg0: i32, %arg1: memref<6xf32, #tpu.memory_space<smem>>, %arg2: memref<6x128x256xf32, #tpu.memory_space<vmem>>, %arg3: memref<1x256xf32, #tpu.memory_space<vmem>>, %arg4: memref<6x256xf32, #tpu.memory_space<vmem>>) attributes {dimension_semantics = [#tpu.dimension_semantics<parallel>], iteration_bounds = array<i64: 2>, scalar_prefetch = 0 : i64, scratch_operands = 0 : i64, tpu.core_type = #tpu.core_type<tc>, window_params = [{transform_indices = @transform_0, window_bounds = array<i64: 6>}, {transform_indices = @transform_1, window_bounds = array<i64: 6, 128, 256>}, {transform_indices = @transform_2, window_bounds = array<i64: 1, 256>}, {transform_indices = @transform_3, window_bounds = array<i64: 6, 256>}]} {
    %c0 = arith.constant 0 : index
    %c0_0 = arith.constant 0 : index
    %c0_1 = arith.constant 0 : index
    %0 = vector.load %arg2[%c0, %c0_0, %c0_1] : memref<6x128x256xf32, #tpu.memory_space<vmem>>, vector<1x128x256xf32>
    %1 = vector.shape_cast %0 : vector<1x128x256xf32> to vector<128x256xf32>
    %c1 = arith.constant 1 : index
    %c0_2 = arith.constant 0 : index
    %c0_3 = arith.constant 0 : index
    %2 = vector.load %arg2[%c1, %c0_2, %c0_3] : memref<6x128x256xf32, #tpu.memory_space<vmem>>, vector<1x128x256xf32>
    %3 = vector.shape_cast %2 : vector<1x128x256xf32> to vector<128x256xf32>
    %c2 = arith.constant 2 : index
    %c0_4 = arith.constant 0 : index
    %c0_5 = arith.constant 0 : index
    %4 = vector.load %arg2[%c2, %c0_4, %c0_5] : memref<6x128x256xf32, #tpu.memory_space<vmem>>, vector<1x128x256xf32>
    %5 = vector.shape_cast %4 : vector<1x128x256xf32> to vector<128x256xf32>
    %c3 = arith.constant 3 : index
    %c0_6 = arith.constant 0 : index
    %c0_7 = arith.constant 0 : index
    %6 = vector.load %arg2[%c3, %c0_6, %c0_7] : memref<6x128x256xf32, #tpu.memory_space<vmem>>, vector<1x128x256xf32>
    %7 = vector.shape_cast %6 : vector<1x128x256xf32> to vector<128x256xf32>
    %c4 = arith.constant 4 : index
    %c0_8 = arith.constant 0 : index
    %c0_9 = arith.constant 0 : index
    %8 = vector.load %arg2[%c4, %c0_8, %c0_9] : memref<6x128x256xf32, #tpu.memory_space<vmem>>, vector<1x128x256xf32>
    %9 = vector.shape_cast %8 : vector<1x128x256xf32> to vector<128x256xf32>
    %c5 = arith.constant 5 : index
    %c0_10 = arith.constant 0 : index
    %c0_11 = arith.constant 0 : index
    %10 = vector.load %arg2[%c5, %c0_10, %c0_11] : memref<6x128x256xf32, #tpu.memory_space<vmem>>, vector<1x128x256xf32>
    %11 = vector.shape_cast %10 : vector<1x128x256xf32> to vector<128x256xf32>
    %12 = arith.mulf %1, %1 : vector<128x256xf32>
    %cst = arith.constant dense<0.000000e+00> : vector<256xf32>
    %13 = vector.multi_reduction <add>, %12, %cst [0] : vector<128x256xf32> to vector<256xf32>
    %14 = vector.shape_cast %13 : vector<256xf32> to vector<1x256xf32>
    %c1_i32 = arith.constant 1 : i32
    %15 = tpu.dynamic_rotate %3 by %c1_i32 dim 0 : vector<128x256xf32>, i32 -> vector<128x256xf32>
    %16 = tpu.iota {dimensions = array<i32: 0>} : vector<128x256xi32>
    %c1_i32_12 = arith.constant 1 : i32
    %17 = vector.broadcast %c1_i32_12 : i32 to vector<128x256xi32>
    %18 = arith.cmpi sge, %16, %17 : vector<128x256xi32>
    %19 = arith.subf %3, %15 : vector<128x256xf32>
    %cst_13 = arith.constant 0.000000e+00 : f32
    %20 = vector.broadcast %cst_13 : f32 to vector<128x256xf32>
    %21 = arith.select %18, %19, %20 : vector<128x256xi1>, vector<128x256xf32>
    %22 = arith.mulf %21, %21 : vector<128x256xf32>
    %cst_14 = arith.constant dense<0.000000e+00> : vector<256xf32>
    %23 = vector.multi_reduction <add>, %22, %cst_14 [0] : vector<128x256xf32> to vector<256xf32>
    %24 = vector.shape_cast %23 : vector<256xf32> to vector<1x256xf32>
    %cst_15 = arith.constant 1.000000e+01 : f32
    %25 = vector.broadcast %cst_15 : f32 to vector<128x256xf32>
    %26 = arith.subf %5, %25 : vector<128x256xf32>
    %27 = arith.mulf %26, %26 : vector<128x256xf32>
    %cst_16 = arith.constant dense<0.000000e+00> : vector<256xf32>
    %28 = vector.multi_reduction <add>, %27, %cst_16 [0] : vector<128x256xf32> to vector<256xf32>
    %29 = vector.shape_cast %28 : vector<256xf32> to vector<1x256xf32>
    %cst_17 = arith.constant 0.000000e+00 : f32
    %30 = vector.broadcast %cst_17 : f32 to vector<128x256xf32>
    %31 = arith.subf %30, %7 : vector<128x256xf32>
    %32 = math.exp %31 : vector<128x256xf32>
    %cst_18 = arith.constant dense<0.000000e+00> : vector<256xf32>
    %33 = vector.multi_reduction <add>, %32, %cst_18 [0] : vector<128x256xf32> to vector<256xf32>
    %34 = vector.shape_cast %33 : vector<256xf32> to vector<1x256xf32>
    %35 = arith.mulf %9, %9 : vector<128x256xf32>
    %cst_19 = arith.constant dense<0.000000e+00> : vector<256xf32>
    %36 = vector.multi_reduction <add>, %35, %cst_19 [0] : vector<128x256xf32> to vector<256xf32>
    %37 = vector.shape_cast %36 : vector<256xf32> to vector<1x256xf32>
    %cst_20 = arith.constant 0.000000e+00 : f32
    %38 = vector.broadcast %cst_20 : f32 to vector<128x256xf32>
    %39 = arith.subf %38, %11 : vector<128x256xf32>
    %40 = math.exp %39 : vector<128x256xf32>
    %cst_21 = arith.constant dense<0.000000e+00> : vector<256xf32>
    %41 = vector.multi_reduction <add>, %40, %cst_21 [0] : vector<128x256xf32> to vector<256xf32>
    %42 = vector.shape_cast %41 : vector<256xf32> to vector<1x256xf32>
    %43 = tpu.concatenate %14, %24, %29, %34, %37, %42 in 0 : vector<1x256xf32>, vector<1x256xf32>, vector<1x256xf32>, vector<1x256xf32>, vector<1x256xf32>, vector<1x256xf32> -> vector<6x256xf32>
    %c0_22 = arith.constant 0 : index
    %c0_23 = arith.constant 0 : index
    %44 = vector.load %arg4[%c0_22, %c0_23] : memref<6x256xf32, #tpu.memory_space<vmem>>, vector<6x256xf32>
    tpu.vector_store %arg4[%c0_22, %c0_23], %43 {strides = array<i32>} : memref<6x256xf32, #tpu.memory_space<vmem>>, vector<6x256xf32>,
    %c0_24 = arith.constant 0 : index
    %45 = memref.load %arg1[%c0_24] : memref<6xf32, #tpu.memory_space<smem>>
    %46 = vector.broadcast %45 : f32 to vector<1x256xf32>
    %47 = arith.mulf %46, %14 : vector<1x256xf32>
    %c1_25 = arith.constant 1 : index
    %48 = memref.load %arg1[%c1_25] : memref<6xf32, #tpu.memory_space<smem>>
    %49 = vector.broadcast %48 : f32 to vector<1x256xf32>
    %50 = arith.mulf %49, %24 : vector<1x256xf32>
    %51 = arith.addf %47, %50 : vector<1x256xf32>
    %c2_26 = arith.constant 2 : index
    %52 = memref.load %arg1[%c2_26] : memref<6xf32, #tpu.memory_space<smem>>
    %53 = vector.broadcast %52 : f32 to vector<1x256xf32>
    %54 = arith.mulf %53, %29 : vector<1x256xf32>
    %55 = arith.addf %51, %54 : vector<1x256xf32>
    %c3_27 = arith.constant 3 : index
    %56 = memref.load %arg1[%c3_27] : memref<6xf32, #tpu.memory_space<smem>>
    %57 = vector.broadcast %56 : f32 to vector<1x256xf32>
    %58 = arith.mulf %57, %34 : vector<1x256xf32>
    %59 = arith.addf %55, %58 : vector<1x256xf32>
    %c4_28 = arith.constant 4 : index
    %60 = memref.load %arg1[%c4_28] : memref<6xf32, #tpu.memory_space<smem>>
    %61 = vector.broadcast %60 : f32 to vector<1x256xf32>
    %62 = arith.mulf %61, %37 : vector<1x256xf32>
    %63 = arith.addf %59, %62 : vector<1x256xf32>
    %c5_29 = arith.constant 5 : index
    %64 = memref.load %arg1[%c5_29] : memref<6xf32, #tpu.memory_space<smem>>
    %65 = vector.broadcast %64 : f32 to vector<1x256xf32>
    %66 = arith.mulf %65, %42 : vector<1x256xf32>
    %67 = arith.addf %63, %66 : vector<1x256xf32>
    %c0_30 = arith.constant 0 : index
    %c0_31 = arith.constant 0 : index
    %68 = vector.load %arg3[%c0_30, %c0_31] : memref<1x256xf32, #tpu.memory_space<vmem>>, vector<1x256xf32>
    tpu.vector_store %arg3[%c0_30, %c0_31], %67 {strides = array<i32>} : memref<1x256xf32, #tpu.memory_space<vmem>>, vector<1x256xf32>,
    return
  }
  func.func @transform_0(%arg0: i32) -> i32 {
    %c0_i32 = arith.constant 0 : i32
    %c0_i32_0 = arith.constant 0 : i32
    return %c0_i32 : i32
  }
  func.func @transform_1(%arg0: i32) -> (i32, i32, i32) {
    %c0_i32 = arith.constant 0 : i32
    %c0_i32_0 = arith.constant 0 : i32
    %c0_i32_1 = arith.constant 0 : i32
    return %c0_i32, %c0_i32_0, %arg0 : i32, i32, i32
  }
  func.func @transform_2(%arg0: i32) -> (i32, i32) {
    %c0_i32 = arith.constant 0 : i32
    %c0_i32_0 = arith.constant 0 : i32
    return %c0_i32, %arg0 : i32, i32
  }
  func.func @transform_3(%arg0: i32) -> (i32, i32) {
    %c0_i32 = arith.constant 0 : i32
    %c0_i32_0 = arith.constant 0 : i32
    return %c0_i32, %arg0 : i32, i32
  }
}

</mosaic_0001>

<bundles_post_ra>
// kernel: linear_cost.1
= control target key start
LH: loop header
LB: loop body
LE: loop exit
PB: predicated region body
PF: predicated region fallthrough
CT: control target
= control target key end

     0   :  { %9 = vsyncpa [#allocation4], 0  ;;  %s3586_s0 = inlined_call_operand.vmem [shape: f32[6], index: 0, kind: input, shape index: {}]   ;;  %s3587_s1 = inlined_call_operand.vmem [shape: f32[6,128,512], index: 1, kind: input, shape index: {}]   ;;  %s3588_s2 = inlined_call_operand.hbm [shape: f32[1,512], index: 2, kind: output, shape index: {0}]   ;;  %s3589_s3 = inlined_call_operand.hbm [shape: f32[6,512], index: 3, kind: output, shape index: {1}]  }
   0x1   :  { %10 = vsyncpa [#allocation3], 0 }
   0x2   :  { %12 = vsyncpa [#allocation3 + $0x1], 0 }
   0x3   :  { %13 = vsyncpa [#allocation8], 0 }
   0x4   :  { %15 = vsyncpa [#allocation8 + $0x1], 0  ;;  %s2322_s12 = smov 0   ;;  %s2324_s13 = smov 0  }
   0x5   :  { %s2326_s14 = smov 0   ;;  %s2328_s15 = smov 0  }
   0x6 LB: > { %s2343_s16 = sadd.s32 4294967295, %s2296_s15   ;;  %s1779_s17 = sadd.s32 4294967294, %s2296_s15   ;;  %s2296_s15 = sphi %s2328_s15, %s3656_s15   ;;  %s2292_s14 = sphi %s2326_s14, %s3655_s14   ;;  %s2288_s13 = sphi %s2324_s13, %s3654_s13   ;;  %s2284_s12 = sphi %s2322_s12, %s3653_s12  }
   0x7   : > { %s2347_s18 = sadd.s32 1, %s2296_s15   ;;  %s49_s19 = sadd.s32 1, %s2292_s14 }
   0x8   : > { %s46_s20 = ssub.s32 %s2296_s15, %s2347_s18  ;;  %p56_p0 = scmp.ne.s32.totalorder %s2292_s14, %s2288_s13 }
   0x9   : > { %p47_p1 = scmp.eq.s32.totalorder %s46_s20, 0  ;;  %p57_p2 = scmp.eq.s32.totalorder %s2296_s15, 0 }
   0xa   : > { %p86_p3 = scmp.eq.s32.totalorder %s2343_s16, 1  ;;  %p91_p4 = scmp.ne.s32.totalorder %s2288_s13, %s2284_s12 }
   0xb   : > { %s2359_s21 = scalar_select %p47_p1, %s2292_s14, %s49_s19  }
   0xc   : > { %p2361_p5 = por %p57_p2, %p56_p0  ;;  %p2365_p6 = por %p86_p3, %p56_p0 }
   0xd   : > { %p92_p7 = scmp.eq.s32.totalorder %s1779_s17, 1  ;;  %p1780_p8 = scmp.ge.s32.totalorder %s2296_s15, 1 }
   0xe   : > { %s3600_s23 = scalar_select %p2365_p6, 1, 0 }
   0xf   : > { %p125_p9 = scmp.lt.s32.totalorder %s2296_s15, 3  ;;  %p2371_p10 = por %p92_p7, %p91_p4 }
  0x10   : > { %p2018_p11 = scmp.eq.s32.totalorder %s2343_s16, 0  ;;  %s138_s28 = sshll.u32 %s3586_s0, 4  ;;  %s139_s28 = int_to_ptr.vmem [resolvable:$true] %s138_s28 }
  0x11   : > { %s3601_s24 = scalar_select %p2371_p10, 1, 0 }
  0x12   : > { %p2376_p12 = pnand %p1780_p8, %p125_p9  ;;  %s2183_s29 = scalar_lea.vmem %s139_s28, 16 }
  0x13   : > { %p2184_p1 = scmp.ne.s32.totalorder %s139_s28, %s2183_s29  ;;  %p2191_p7 = scmp.lt.s32.totalorder %s139_s28, %s139_s28 }
  0x14   : > { %p2007_p13 = pneg %p2376_p12  ;;  %p2192_p8 = scmp.lt.s32.totalorder %s2183_s29, %s2183_s29 }
  0x16   : > { %p2008_p0 = pnand %p2018_p11, %p2007_p13  ;;  %p2193_p9 = por %p2192_p8, %p2191_p7 }
  0x18   : > { %p2185_p2 = pneg %p2008_p0 }
  0x1a   : > { %p2186_p3 = pnand %p2185_p2, %p2184_p1 }
  0x1c   : > { %p2187_p4 = pneg %p2186_p3 }
  0x1e   : > { %p2194_p10 = pnand %p2193_p9, %p2187_p4 }
  0x20   : > { %2197 = shalt.err (!%p2194_p10)
}
  0x21   : > { %s2298_s30 = smov [#allocation2]   ;;  %p1782_p6 = scmp.ge.s32.totalorder %s2296_s15, 2 }
  0x22   : > { %2010 = dma.vmem_to_smem (!%p2008_p0), %s139_s28, 16, %s2298_s30, [#allocation4]  }
  0x23   : > { %145 = sbr.rel (%p1782_p6) target bundleno = 142 (0x8e), region = 20 }
  0x2a   : > { %148 = sbr.rel (!%p2361_p5) target bundleno = 142 (0x8e), region = 24  ;;  %s150_s4 = sand.u32 (%p2361_p5), 1, %s2292_s14  }
  0x2b   : > { %s1994_s5 = sshll.u32 (%p2361_p5), %s2296_s15, 4  ;;  %s1997_s6 = smul.u32 (%p2361_p5), 1536, %s150_s4 }
  0x2c   : > { %s2397_s9 = scalar_lea.vmem (%p2361_p5), %s3587_s1, %s1994_s5 }
  0x2d   : > { %v168_v0 = vld [vmem:[%s2397_s9] sm:$0xff] (%p2361_p5)  ;;  %v170_v1 = vld [vmem:[%s2397_s9 + $0x8] sm:$0xff] (%p2361_p5)  ;;  %s2405_s10 = scalar_lea.vmem (%p2361_p5), [#allocation5], %s1997_s6 }
  0x2e   : > { %v172_v2 = vld [vmem:[%s2397_s9 + $0x20] sm:$0xff] (%p2361_p5)  ;;  %v174_v3 = vld [vmem:[%s2397_s9 + $0x28] sm:$0xff] (%p2361_p5)  ;;  %169 = vst [vmem:[%s2405_s10] sm:$0xff] (%p2361_p5), %v168_v0  ;;  %171 = vst [vmem:[%s2405_s10 + $0x8] sm:$0xff] (%p2361_p5), %v170_v1 }
  0x2f   : > { %v176_v4 = vld [vmem:[%s2397_s9 + $0x40] sm:$0xff] (%p2361_p5)  ;;  %v178_v5 = vld [vmem:[%s2397_s9 + $0x48] sm:$0xff] (%p2361_p5)  ;;  %173 = vst [vmem:[%s2405_s10 + $0x10] sm:$0xff] (%p2361_p5), %v172_v2  ;;  %175 = vst [vmem:[%s2405_s10 + $0x18] sm:$0xff] (%p2361_p5), %v174_v3 }
  0x30   : > { %177 = vst [vmem:[%s2405_s10 + $0x20] sm:$0xff] (%p2361_p5), %v176_v4  ;;  %179 = vst [vmem:[%s2405_s10 + $0x28] sm:$0xff] (%p2361_p5), %v178_v5  ;;  %v180_v6 = vld [vmem:[%s2397_s9 + $0x60] sm:$0xff] (%p2361_p5)  ;;  %v182_v7 = vld [vmem:[%s2397_s9 + $0x68] sm:$0xff] (%p2361_p5) }
  0x31   : > { %v184_v8 = vld [vmem:[%s2397_s9 + $0x80] sm:$0xff]  ;;  %181 = vst [vmem:[%s2405_s10 + $0x30] sm:$0xff] %v180_v6  ;;  %183 = vst [vmem:[%s2405_s10 + $0x38] sm:$0xff] %v182_v7  ;;  %v186_v9 = vld [vmem:[%s2397_s9 + $0x88] sm:$0xff] }
  0x32   : > { %185 = vst [vmem:[%s2405_s10 + $0x40] sm:$0xff] %v184_v8  ;;  %v188_v10 = vld [vmem:[%s2397_s9 + $0xa0] sm:$0xff]  ;;  %v190_v11 = vld [vmem:[%s2397_s9 + $0xa8] sm:$0xff]  ;;  %187 = vst [vmem:[%s2405_s10 + $0x48] sm:$0xff] %v186_v9 }
  0x33   : > { %189 = vst [vmem:[%s2405_s10 + $0x50] sm:$0xff] %v188_v10  ;;  %191 = vst [vmem:[%s2405_s10 + $0x58] sm:$0xff] %v190_v11  ;;  %v192_v12 = vld [vmem:[%s2397_s9 + $0xc0] sm:$0xff]  ;;  %v194_v13 = vld [vmem:[%s2397_s9 + $0xc8] sm:$0xff] }
  0x34   : > { %v196_v14 = vld [vmem:[%s2397_s9 + $0xe0] sm:$0xff]  ;;  %193 = vst [vmem:[%s2405_s10 + $0x60] sm:$0xff] %v192_v12  ;;  %195 = vst [vmem:[%s2405_s10 + $0x68] sm:$0xff] %v194_v13  ;;  %v198_v15 = vld [vmem:[%s2397_s9 + $0xe8] sm:$0xff] }
  0x35   : > { %197 = vst [vmem:[%s2405_s10 + $0x70] sm:$0xff] %v196_v14  ;;  %v200_v16 = vld [vmem:[%s2397_s9 + $0x100] sm:$0xff]  ;;  %v202_v17 = vld [vmem:[%s2397_s9 + $0x108] sm:$0xff]  ;;  %199 = vst [vmem:[%s2405_s10 + $0x78] sm:$0xff] %v198_v15 }
  0x36   : > { %201 = vst [vmem:[%s2405_s10 + $0x80] sm:$0xff] %v200_v16  ;;  %203 = vst [vmem:[%s2405_s10 + $0x88] sm:$0xff] %v202_v17  ;;  %v204_v18 = vld [vmem:[%s2397_s9 + $0x120] sm:$0xff]  ;;  %v206_v19 = vld [vmem:[%s2397_s9 + $0x128] sm:$0xff] }
  0x37   : > { %v208_v20 = vld [vmem:[%s2397_s9 + $0x140] sm:$0xff]  ;;  %205 = vst [vmem:[%s2405_s10 + $0x90] sm:$0xff] %v204_v18  ;;  %207 = vst [vmem:[%s2405_s10 + $0x98] sm:$0xff] %v206_v19  ;;  %v210_v21 = vld [vmem:[%s2397_s9 + $0x148] sm:$0xff] }
  0x38   : > { %209 = vst [vmem:[%s2405_s10 + $0xa0] sm:$0xff] %v208_v20  ;;  %v212_v22 = vld [vmem:[%s2397_s9 + $0x160] sm:$0xff]  ;;  %v214_v23 = vld [vmem:[%s2397_s9 + $0x168] sm:$0xff]  ;;  %211 = vst [vmem:[%s2405_s10 + $0xa8] sm:$0xff] %v210_v21 }
  0x39   : > { %213 = vst [vmem:[%s2405_s10 + $0xb0] sm:$0xff] %v212_v22  ;;  %215 = vst [vmem:[%s2405_s10 + $0xb8] sm:$0xff] %v214_v23  ;;  %v216_v24 = vld [vmem:[%s2397_s9 + $0x180] sm:$0xff]  ;;  %v218_v25 = vld [vmem:[%s2397_s9 + $0x188] sm:$0xff] }
  0x3a   : > { %v220_v26 = vld [vmem:[%s2397_s9 + $0x1a0] sm:$0xff]  ;;  %217 = vst [vmem:[%s2405_s10 + $0xc0] sm:$0xff] %v216_v24  ;;  %219 = vst [vmem:[%s2405_s10 + $0xc8] sm:$0xff] %v218_v25  ;;  %v222_v27 = vld [vmem:[%s2397_s9 + $0x1a8] sm:$0xff] }
  0x3b   : > { %221 = vst [vmem:[%s2405_s10 + $0xd0] sm:$0xff] %v220_v26  ;;  %v224_v28 = vld [vmem:[%s2397_s9 + $0x1c0] sm:$0xff]  ;;  %v226_v29 = vld [vmem:[%s2397_s9 + $0x1c8] sm:$0xff]  ;;  %223 = vst [vmem:[%s2405_s10 + $0xd8] sm:$0xff] %v222_v27 }
  0x3c   : > { %225 = vst [vmem:[%s2405_s10 + $0xe0] sm:$0xff] %v224_v28  ;;  %227 = vst [vmem:[%s2405_s10 + $0xe8] sm:$0xff] %v226_v29  ;;  %v228_v30 = vld [vmem:[%s2397_s9 + $0x1e0] sm:$0xff]  ;;  %v230_v31 = vld [vmem:[%s2397_s9 + $0x1e8] sm:$0xff] }
  0x3d   : > { %v232_v32 = vld [vmem:[%s2397_s9 + $0x200] sm:$0xff]  ;;  %229 = vst [vmem:[%s2405_s10 + $0xf0] sm:$0xff] %v228_v30  ;;  %231 = vst [vmem:[%s2405_s10 + $0xf8] sm:$0xff] %v230_v31  ;;  %v234_v33 = vld [vmem:[%s2397_s9 + $0x208] sm:$0xff] }
  0x3e   : > { %233 = vst [vmem:[%s2405_s10 + $0x100] sm:$0xff] %v232_v32  ;;  %v236_v34 = vld [vmem:[%s2397_s9 + $0x220] sm:$0xff]  ;;  %v238_v35 = vld [vmem:[%s2397_s9 + $0x228] sm:$0xff]  ;;  %235 = vst [vmem:[%s2405_s10 + $0x108] sm:$0xff] %v234_v33 }
  0x3f   : > { %237 = vst [vmem:[%s2405_s10 + $0x110] sm:$0xff] %v236_v34  ;;  %239 = vst [vmem:[%s2405_s10 + $0x118] sm:$0xff] %v238_v35  ;;  %v240_v36 = vld [vmem:[%s2397_s9 + $0x240] sm:$0xff]  ;;  %v242_v37 = vld [vmem:[%s2397_s9 + $0x248] sm:$0xff] }
  0x40   : > { %v244_v38 = vld [vmem:[%s2397_s9 + $0x260] sm:$0xff]  ;;  %241 = vst [vmem:[%s2405_s10 + $0x120] sm:$0xff] %v240_v36  ;;  %243 = vst [vmem:[%s2405_s10 + $0x128] sm:$0xff] %v242_v37  ;;  %v246_v39 = vld [vmem:[%s2397_s9 + $0x268] sm:$0xff] }
  0x41   : > { %245 = vst [vmem:[%s2405_s10 + $0x130] sm:$0xff] %v244_v38  ;;  %v248_v40 = vld [vmem:[%s2397_s9 + $0x280] sm:$0xff]  ;;  %v250_v41 = vld [vmem:[%s2397_s9 + $0x288] sm:$0xff]  ;;  %247 = vst [vmem:[%s2405_s10 + $0x138] sm:$0xff] %v246_v39 }
  0x42   : > { %249 = vst [vmem:[%s2405_s10 + $0x140] sm:$0xff] %v248_v40  ;;  %251 = vst [vmem:[%s2405_s10 + $0x148] sm:$0xff] %v250_v41  ;;  %v252_v42 = vld [vmem:[%s2397_s9 + $0x2a0] sm:$0xff]  ;;  %v254_v43 = vld [vmem:[%s2397_s9 + $0x2a8] sm:$0xff] }
  0x43   : > { %v256_v44 = vld [vmem:[%s2397_s9 + $0x2c0] sm:$0xff]  ;;  %253 = vst [vmem:[%s2405_s10 + $0x150] sm:$0xff] %v252_v42  ;;  %255 = vst [vmem:[%s2405_s10 + $0x158] sm:$0xff] %v254_v43  ;;  %v258_v45 = vld [vmem:[%s2397_s9 + $0x2c8] sm:$0xff] }
  0x44   : > { %257 = vst [vmem:[%s2405_s10 + $0x160] sm:$0xff] %v256_v44  ;;  %v260_v46 = vld [vmem:[%s2397_s9 + $0x2e0] sm:$0xff]  ;;  %v262_v47 = vld [vmem:[%s2397_s9 + $0x2e8] sm:$0xff]  ;;  %259 = vst [vmem:[%s2405_s10 + $0x168] sm:$0xff] %v258_v45 }
  0x45   : > { %261 = vst [vmem:[%s2405_s10 + $0x170] sm:$0xff] %v260_v46  ;;  %263 = vst [vmem:[%s2405_s10 + $0x178] sm:$0xff] %v262_v47  ;;  %v264_v48 = vld [vmem:[%s2397_s9 + $0x300] sm:$0xff]  ;;  %v266_v49 = vld [vmem:[%s2397_s9 + $0x308] sm:$0xff] }
  0x46   : > { %v268_v50 = vld [vmem:[%s2397_s9 + $0x320] sm:$0xff]  ;;  %265 = vst [vmem:[%s2405_s10 + $0x180] sm:$0xff] %v264_v48  ;;  %267 = vst [vmem:[%s2405_s10 + $0x188] sm:$0xff] %v266_v49  ;;  %v270_v51 = vld [vmem:[%s2397_s9 + $0x328] sm:$0xff] }
  0x47   : > { %269 = vst [vmem:[%s2405_s10 + $0x190] sm:$0xff] %v268_v50  ;;  %v272_v52 = vld [vmem:[%s2397_s9 + $0x340] sm:$0xff]  ;;  %v274_v53 = vld [vmem:[%s2397_s9 + $0x348] sm:$0xff]  ;;  %271 = vst [vmem:[%s2405_s10 + $0x198] sm:$0xff] %v270_v51 }
  0x48   : > { %273 = vst [vmem:[%s2405_s10 + $0x1a0] sm:$0xff] %v272_v52  ;;  %275 = vst [vmem:[%s2405_s10 + $0x1a8] sm:$0xff] %v274_v53  ;;  %v276_v54 = vld [vmem:[%s2397_s9 + $0x360] sm:$0xff]  ;;  %v278_v55 = vld [vmem:[%s2397_s9 + $0x368] sm:$0xff] }
  0x49   : > { %v280_v56 = vld [vmem:[%s2397_s9 + $0x380] sm:$0xff]  ;;  %277 = vst [vmem:[%s2405_s10 + $0x1b0] sm:$0xff] %v276_v54  ;;  %279 = vst [vmem:[%s2405_s10 + $0x1b8] sm:$0xff] %v278_v55  ;;  %v282_v57 = vld [vmem:[%s2397_s9 + $0x388] sm:$0xff] }
  0x4a   : > { %281 = vst [vmem:[%s2405_s10 + $0x1c0] sm:$0xff] %v280_v56  ;;  %v284_v58 = vld [vmem:[%s2397_s9 + $0x3a0] sm:$0xff]  ;;  %v286_v59 = vld [vmem:[%s2397_s9 + $0x3a8] sm:$0xff]  ;;  %283 = vst [vmem:[%s2405_s10 + $0x1c8] sm:$0xff] %v282_v57 }
  0x4b   : > { %285 = vst [vmem:[%s2405_s10 + $0x1d0] sm:$0xff] %v284_v58  ;;  %287 = vst [vmem:[%s2405_s10 + $0x1d8] sm:$0xff] %v286_v59  ;;  %v288_v60 = vld [vmem:[%s2397_s9 + $0x3c0] sm:$0xff]  ;;  %v290_v61 = vld [vmem:[%s2397_s9 + $0x3c8] sm:$0xff] }
  0x4c   : > { %v292_v62 = vld [vmem:[%s2397_s9 + $0x3e0] sm:$0xff]  ;;  %289 = vst [vmem:[%s2405_s10 + $0x1e0] sm:$0xff] %v288_v60  ;;  %291 = vst [vmem:[%s2405_s10 + $0x1e8] sm:$0xff] %v290_v61  ;;  %v294_v63 = vld [vmem:[%s2397_s9 + $0x3e8] sm:$0xff] }
  0x4d   : > { %293 = vst [vmem:[%s2405_s10 + $0x1f0] sm:$0xff] %v292_v62  ;;  %v296_v0 = vld [vmem:[%s2397_s9 + $0x400] sm:$0xff]  ;;  %v298_v1 = vld [vmem:[%s2397_s9 + $0x408] sm:$0xff]  ;;  %295 = vst [vmem:[%s2405_s10 + $0x1f8] sm:$0xff] %v294_v63 }
  0x4e   : > { %297 = vst [vmem:[%s2405_s10 + $0x200] sm:$0xff] %v296_v0  ;;  %299 = vst [vmem:[%s2405_s10 + $0x208] sm:$0xff] %v298_v1  ;;  %v300_v2 = vld [vmem:[%s2397_s9 + $0x420] sm:$0xff]  ;;  %v302_v3 = vld [vmem:[%s2397_s9 + $0x428] sm:$0xff] }
  0x4f   : > { %v304_v4 = vld [vmem:[%s2397_s9 + $0x440] sm:$0xff]  ;;  %301 = vst [vmem:[%s2405_s10 + $0x210] sm:$0xff] %v300_v2  ;;  %303 = vst [vmem:[%s2405_s10 + $0x218] sm:$0xff] %v302_v3  ;;  %v306_v5 = vld [vmem:[%s2397_s9 + $0x448] sm:$0xff] }
  0x50   : > { %305 = vst [vmem:[%s2405_s10 + $0x220] sm:$0xff] %v304_v4  ;;  %v308_v6 = vld [vmem:[%s2397_s9 + $0x460] sm:$0xff]  ;;  %v310_v7 = vld [vmem:[%s2397_s9 + $0x468] sm:$0xff]  ;;  %307 = vst [vmem:[%s2405_s10 + $0x228] sm:$0xff] %v306_v5 }
  0x51   : > { %309 = vst [vmem:[%s2405_s10 + $0x230] sm:$0xff] %v308_v6  ;;  %311 = vst [vmem:[%s2405_s10 + $0x238] sm:$0xff] %v310_v7  ;;  %v312_v8 = vld [vmem:[%s2397_s9 + $0x480] sm:$0xff]  ;;  %v314_v9 = vld [vmem:[%s2397_s9 + $0x488] sm:$0xff] }
  0x52   : > { %v316_v10 = vld [vmem:[%s2397_s9 + $0x4a0] sm:$0xff]  ;;  %313 = vst [vmem:[%s2405_s10 + $0x240] sm:$0xff] %v312_v8  ;;  %315 = vst [vmem:[%s2405_s10 + $0x248] sm:$0xff] %v314_v9  ;;  %v318_v11 = vld [vmem:[%s2397_s9 + $0x4a8] sm:$0xff] }
  0x53   : > { %317 = vst [vmem:[%s2405_s10 + $0x250] sm:$0xff] %v316_v10  ;;  %v320_v12 = vld [vmem:[%s2397_s9 + $0x4c0] sm:$0xff]  ;;  %v322_v13 = vld [vmem:[%s2397_s9 + $0x4c8] sm:$0xff]  ;;  %319 = vst [vmem:[%s2405_s10 + $0x258] sm:$0xff] %v318_v11 }
  0x54   : > { %321 = vst [vmem:[%s2405_s10 + $0x260] sm:$0xff] %v320_v12  ;;  %323 = vst [vmem:[%s2405_s10 + $0x268] sm:$0xff] %v322_v13  ;;  %v324_v14 = vld [vmem:[%s2397_s9 + $0x4e0] sm:$0xff]  ;;  %v326_v15 = vld [vmem:[%s2397_s9 + $0x4e8] sm:$0xff] }
  0x55   : > { %v328_v16 = vld [vmem:[%s2397_s9 + $0x500] sm:$0xff]  ;;  %325 = vst [vmem:[%s2405_s10 + $0x270] sm:$0xff] %v324_v14  ;;  %327 = vst [vmem:[%s2405_s10 + $0x278] sm:$0xff] %v326_v15  ;;  %v330_v17 = vld [vmem:[%s2397_s9 + $0x508] sm:$0xff] }
  0x56   : > { %329 = vst [vmem:[%s2405_s10 + $0x280] sm:$0xff] %v328_v16  ;;  %v332_v18 = vld [vmem:[%s2397_s9 + $0x520] sm:$0xff]  ;;  %v334_v19 = vld [vmem:[%s2397_s9 + $0x528] sm:$0xff]  ;;  %331 = vst [vmem:[%s2405_s10 + $0x288] sm:$0xff] %v330_v17 }
  0x57   : > { %333 = vst [vmem:[%s2405_s10 + $0x290] sm:$0xff] %v332_v18  ;;  %335 = vst [vmem:[%s2405_s10 + $0x298] sm:$0xff] %v334_v19  ;;  %v336_v20 = vld [vmem:[%s2397_s9 + $0x540] sm:$0xff]  ;;  %v338_v21 = vld [vmem:[%s2397_s9 + $0x548] sm:$0xff] }
  0x58   : > { %v340_v22 = vld [vmem:[%s2397_s9 + $0x560] sm:$0xff]  ;;  %337 = vst [vmem:[%s2405_s10 + $0x2a0] sm:$0xff] %v336_v20  ;;  %339 = vst [vmem:[%s2405_s10 + $0x2a8] sm:$0xff] %v338_v21  ;;  %v342_v23 = vld [vmem:[%s2397_s9 + $0x568] sm:$0xff] }
  0x59   : > { %341 = vst [vmem:[%s2405_s10 + $0x2b0] sm:$0xff] %v340_v22  ;;  %v344_v24 = vld [vmem:[%s2397_s9 + $0x580] sm:$0xff]  ;;  %v346_v25 = vld [vmem:[%s2397_s9 + $0x588] sm:$0xff]  ;;  %343 = vst [vmem:[%s2405_s10 + $0x2b8] sm:$0xff] %v342_v23 }
  0x5a   : > { %345 = vst [vmem:[%s2405_s10 + $0x2c0] sm:$0xff] %v344_v24  ;;  %347 = vst [vmem:[%s2405_s10 + $0x2c8] sm:$0xff] %v346_v25  ;;  %v348_v26 = vld [vmem:[%s2397_s9 + $0x5a0] sm:$0xff]  ;;  %v350_v27 = vld [vmem:[%s2397_s9 + $0x5a8] sm:$0xff] }
  0x5b   : > { %v352_v28 = vld [vmem:[%s2397_s9 + $0x5c0] sm:$0xff]  ;;  %349 = vst [vmem:[%s2405_s10 + $0x2d0] sm:$0xff] %v348_v26  ;;  %351 = vst [vmem:[%s2405_s10 + $0x2d8] sm:$0xff] %v350_v27  ;;  %v354_v29 = vld [vmem:[%s2397_s9 + $0x5c8] sm:$0xff] }
  0x5c   : > { %353 = vst [vmem:[%s2405_s10 + $0x2e0] sm:$0xff] %v352_v28  ;;  %v356_v30 = vld [vmem:[%s2397_s9 + $0x5e0] sm:$0xff]  ;;  %v358_v31 = vld [vmem:[%s2397_s9 + $0x5e8] sm:$0xff]  ;;  %355 = vst [vmem:[%s2405_s10 + $0x2e8] sm:$0xff] %v354_v29 }
  0x5d   : > { %357 = vst [vmem:[%s2405_s10 + $0x2f0] sm:$0xff] %v356_v30  ;;  %359 = vst [vmem:[%s2405_s10 + $0x2f8] sm:$0xff] %v358_v31  ;;  %v360_v32 = vld [vmem:[%s2397_s9 + $0x600] sm:$0xff]  ;;  %v362_v33 = vld [vmem:[%s2397_s9 + $0x608] sm:$0xff] }
  0x5e   : > { %v364_v34 = vld [vmem:[%s2397_s9 + $0x620] sm:$0xff]  ;;  %361 = vst [vmem:[%s2405_s10 + $0x300] sm:$0xff] %v360_v32  ;;  %363 = vst [vmem:[%s2405_s10 + $0x308] sm:$0xff] %v362_v33  ;;  %v366_v35 = vld [vmem:[%s2397_s9 + $0x628] sm:$0xff] }
  0x5f   : > { %365 = vst [vmem:[%s2405_s10 + $0x310] sm:$0xff] %v364_v34  ;;  %v368_v36 = vld [vmem:[%s2397_s9 + $0x640] sm:$0xff]  ;;  %v370_v37 = vld [vmem:[%s2397_s9 + $0x648] sm:$0xff]  ;;  %367 = vst [vmem:[%s2405_s10 + $0x318] sm:$0xff] %v366_v35 }
  0x60   : > { %369 = vst [vmem:[%s2405_s10 + $0x320] sm:$0xff] %v368_v36  ;;  %371 = vst [vmem:[%s2405_s10 + $0x328] sm:$0xff] %v370_v37  ;;  %v372_v38 = vld [vmem:[%s2397_s9 + $0x660] sm:$0xff]  ;;  %v374_v39 = vld [vmem:[%s2397_s9 + $0x668] sm:$0xff] }
  0x61   : > { %v376_v40 = vld [vmem:[%s2397_s9 + $0x680] sm:$0xff]  ;;  %373 = vst [vmem:[%s2405_s10 + $0x330] sm:$0xff] %v372_v38  ;;  %375 = vst [vmem:[%s2405_s10 + $0x338] sm:$0xff] %v374_v39  ;;  %v378_v41 = vld [vmem:[%s2397_s9 + $0x688] sm:$0xff] }
  0x62   : > { %377 = vst [vmem:[%s2405_s10 + $0x340] sm:$0xff] %v376_v40  ;;  %v380_v42 = vld [vmem:[%s2397_s9 + $0x6a0] sm:$0xff]  ;;  %v382_v43 = vld [vmem:[%s2397_s9 + $0x6a8] sm:$0xff]  ;;  %379 = vst [vmem:[%s2405_s10 + $0x348] sm:$0xff] %v378_v41 }
  0x63   : > { %381 = vst [vmem:[%s2405_s10 + $0x350] sm:$0xff] %v380_v42  ;;  %383 = vst [vmem:[%s2405_s10 + $0x358] sm:$0xff] %v382_v43  ;;  %v384_v44 = vld [vmem:[%s2397_s9 + $0x6c0] sm:$0xff]  ;;  %v386_v45 = vld [vmem:[%s2397_s9 + $0x6c8] sm:$0xff] }
  0x64   : > { %v388_v46 = vld [vmem:[%s2397_s9 + $0x6e0] sm:$0xff]  ;;  %385 = vst [vmem:[%s2405_s10 + $0x360] sm:$0xff] %v384_v44  ;;  %387 = vst [vmem:[%s2405_s10 + $0x368] sm:$0xff] %v386_v45  ;;  %v390_v47 = vld [vmem:[%s2397_s9 + $0x6e8] sm:$0xff] }
  0x65   : > { %389 = vst [vmem:[%s2405_s10 + $0x370] sm:$0xff] %v388_v46  ;;  %v392_v48 = vld [vmem:[%s2397_s9 + $0x700] sm:$0xff]  ;;  %v394_v49 = vld [vmem:[%s2397_s9 + $0x708] sm:$0xff]  ;;  %391 = vst [vmem:[%s2405_s10 + $0x378] sm:$0xff] %v390_v47 }
  0x66   : > { %393 = vst [vmem:[%s2405_s10 + $0x380] sm:$0xff] %v392_v48  ;;  %395 = vst [vmem:[%s2405_s10 + $0x388] sm:$0xff] %v394_v49  ;;  %v396_v50 = vld [vmem:[%s2397_s9 + $0x720] sm:$0xff]  ;;  %v398_v51 = vld [vmem:[%s2397_s9 + $0x728] sm:$0xff] }
  0x67   : > { %v400_v52 = vld [vmem:[%s2397_s9 + $0x740] sm:$0xff]  ;;  %397 = vst [vmem:[%s2405_s10 + $0x390] sm:$0xff] %v396_v50  ;;  %399 = vst [vmem:[%s2405_s10 + $0x398] sm:$0xff] %v398_v51  ;;  %v402_v53 = vld [vmem:[%s2397_s9 + $0x748] sm:$0xff] }
  0x68   : > { %401 = vst [vmem:[%s2405_s10 + $0x3a0] sm:$0xff] %v400_v52  ;;  %v404_v54 = vld [vmem:[%s2397_s9 + $0x760] sm:$0xff]  ;;  %v406_v55 = vld [vmem:[%s2397_s9 + $0x768] sm:$0xff]  ;;  %403 = vst [vmem:[%s2405_s10 + $0x3a8] sm:$0xff] %v402_v53 }
  0x69   : > { %405 = vst [vmem:[%s2405_s10 + $0x3b0] sm:$0xff] %v404_v54  ;;  %407 = vst [vmem:[%s2405_s10 + $0x3b8] sm:$0xff] %v406_v55  ;;  %v408_v56 = vld [vmem:[%s2397_s9 + $0x780] sm:$0xff]  ;;  %v410_v57 = vld [vmem:[%s2397_s9 + $0x788] sm:$0xff] }
  0x6a   : > { %v412_v58 = vld [vmem:[%s2397_s9 + $0x7a0] sm:$0xff]  ;;  %409 = vst [vmem:[%s2405_s10 + $0x3c0] sm:$0xff] %v408_v56  ;;  %411 = vst [vmem:[%s2405_s10 + $0x3c8] sm:$0xff] %v410_v57  ;;  %v414_v59 = vld [vmem:[%s2397_s9 + $0x7a8] sm:$0xff] }
  0x6b   : > { %413 = vst [vmem:[%s2405_s10 + $0x3d0] sm:$0xff] %v412_v58  ;;  %v416_v60 = vld [vmem:[%s2397_s9 + $0x7c0] sm:$0xff]  ;;  %v418_v61 = vld [vmem:[%s2397_s9 + $0x7c8] sm:$0xff]  ;;  %415 = vst [vmem:[%s2405_s10 + $0x3d8] sm:$0xff] %v414_v59 }
  0x6c   : > { %417 = vst [vmem:[%s2405_s10 + $0x3e0] sm:$0xff] %v416_v60  ;;  %419 = vst [vmem:[%s2405_s10 + $0x3e8] sm:$0xff] %v418_v61  ;;  %v420_v62 = vld [vmem:[%s2397_s9 + $0x7e0] sm:$0xff]  ;;  %v422_v63 = vld [vmem:[%s2397_s9 + $0x7e8] sm:$0xff] }
  0x6d   : > { %v424_v0 = vld [vmem:[%s2397_s9 + $0x800] sm:$0xff]  ;;  %421 = vst [vmem:[%s2405_s10 + $0x3f0] sm:$0xff] %v420_v62  ;;  %423 = vst [vmem:[%s2405_s10 + $0x3f8] sm:$0xff] %v422_v63  ;;  %v426_v1 = vld [vmem:[%s2397_s9 + $0x808] sm:$0xff] }
  0x6e   : > { %425 = vst [vmem:[%s2405_s10 + $0x400] sm:$0xff] %v424_v0  ;;  %v428_v2 = vld [vmem:[%s2397_s9 + $0x820] sm:$0xff]  ;;  %v430_v3 = vld [vmem:[%s2397_s9 + $0x828] sm:$0xff]  ;;  %427 = vst [vmem:[%s2405_s10 + $0x408] sm:$0xff] %v426_v1 }
  0x6f   : > { %429 = vst [vmem:[%s2405_s10 + $0x410] sm:$0xff] %v428_v2  ;;  %431 = vst [vmem:[%s2405_s10 + $0x418] sm:$0xff] %v430_v3  ;;  %v432_v4 = vld [vmem:[%s2397_s9 + $0x840] sm:$0xff]  ;;  %v434_v5 = vld [vmem:[%s2397_s9 + $0x848] sm:$0xff] }
  0x70   : > { %v436_v6 = vld [vmem:[%s2397_s9 + $0x860] sm:$0xff]  ;;  %433 = vst [vmem:[%s2405_s10 + $0x420] sm:$0xff] %v432_v4  ;;  %435 = vst [vmem:[%s2405_s10 + $0x428] sm:$0xff] %v434_v5  ;;  %v438_v7 = vld [vmem:[%s2397_s9 + $0x868] sm:$0xff] }
  0x71   : > { %437 = vst [vmem:[%s2405_s10 + $0x430] sm:$0xff] %v436_v6  ;;  %v440_v8 = vld [vmem:[%s2397_s9 + $0x880] sm:$0xff]  ;;  %v442_v9 = vld [vmem:[%s2397_s9 + $0x888] sm:$0xff]  ;;  %439 = vst [vmem:[%s2405_s10 + $0x438] sm:$0xff] %v438_v7 }
  0x72   : > { %441 = vst [vmem:[%s2405_s10 + $0x440] sm:$0xff] %v440_v8  ;;  %443 = vst [vmem:[%s2405_s10 + $0x448] sm:$0xff] %v442_v9  ;;  %v444_v10 = vld [vmem:[%s2397_s9 + $0x8a0] sm:$0xff]  ;;  %v446_v11 = vld [vmem:[%s2397_s9 + $0x8a8] sm:$0xff] }
  0x73   : > { %v448_v12 = vld [vmem:[%s2397_s9 + $0x8c0] sm:$0xff]  ;;  %445 = vst [vmem:[%s2405_s10 + $0x450] sm:$0xff] %v444_v10  ;;  %447 = vst [vmem:[%s2405_s10 + $0x458] sm:$0xff] %v446_v11  ;;  %v450_v13 = vld [vmem:[%s2397_s9 + $0x8c8] sm:$0xff] }
  0x74   : > { %449 = vst [vmem:[%s2405_s10 + $0x460] sm:$0xff] %v448_v12  ;;  %v452_v14 = vld [vmem:[%s2397_s9 + $0x8e0] sm:$0xff]  ;;  %v454_v15 = vld [vmem:[%s2397_s9 + $0x8e8] sm:$0xff]  ;;  %451 = vst [vmem:[%s2405_s10 + $0x468] sm:$0xff] %v450_v13 }
  0x75   : > { %453 = vst [vmem:[%s2405_s10 + $0x470] sm:$0xff] %v452_v14  ;;  %455 = vst [vmem:[%s2405_s10 + $0x478] sm:$0xff] %v454_v15  ;;  %v456_v16 = vld [vmem:[%s2397_s9 + $0x900] sm:$0xff]  ;;  %v458_v17 = vld [vmem:[%s2397_s9 + $0x908] sm:$0xff] }
  0x76   : > { %v460_v18 = vld [vmem:[%s2397_s9 + $0x920] sm:$0xff]  ;;  %457 = vst [vmem:[%s2405_s10 + $0x480] sm:$0xff] %v456_v16  ;;  %459 = vst [vmem:[%s2405_s10 + $0x488] sm:$0xff] %v458_v17  ;;  %v462_v19 = vld [vmem:[%s2397_s9 + $0x928] sm:$0xff] }
  0x77   : > { %461 = vst [vmem:[%s2405_s10 + $0x490] sm:$0xff] %v460_v18  ;;  %v464_v20 = vld [vmem:[%s2397_s9 + $0x940] sm:$0xff]  ;;  %v466_v21 = vld [vmem:[%s2397_s9 + $0x948] sm:$0xff]  ;;  %463 = vst [vmem:[%s2405_s10 + $0x498] sm:$0xff] %v462_v19 }
  0x78   : > { %465 = vst [vmem:[%s2405_s10 + $0x4a0] sm:$0xff] %v464_v20  ;;  %467 = vst [vmem:[%s2405_s10 + $0x4a8] sm:$0xff] %v466_v21  ;;  %v468_v22 = vld [vmem:[%s2397_s9 + $0x960] sm:$0xff]  ;;  %v470_v23 = vld [vmem:[%s2397_s9 + $0x968] sm:$0xff] }
  0x79   : > { %v472_v24 = vld [vmem:[%s2397_s9 + $0x980] sm:$0xff]  ;;  %469 = vst [vmem:[%s2405_s10 + $0x4b0] sm:$0xff] %v468_v22  ;;  %471 = vst [vmem:[%s2405_s10 + $0x4b8] sm:$0xff] %v470_v23  ;;  %v474_v25 = vld [vmem:[%s2397_s9 + $0x988] sm:$0xff] }
  0x7a   : > { %473 = vst [vmem:[%s2405_s10 + $0x4c0] sm:$0xff] %v472_v24  ;;  %v476_v26 = vld [vmem:[%s2397_s9 + $0x9a0] sm:$0xff]  ;;  %v478_v27 = vld [vmem:[%s2397_s9 + $0x9a8] sm:$0xff]  ;;  %475 = vst [vmem:[%s2405_s10 + $0x4c8] sm:$0xff] %v474_v25 }
  0x7b   : > { %477 = vst [vmem:[%s2405_s10 + $0x4d0] sm:$0xff] %v476_v26  ;;  %479 = vst [vmem:[%s2405_s10 + $0x4d8] sm:$0xff] %v478_v27  ;;  %v480_v28 = vld [vmem:[%s2397_s9 + $0x9c0] sm:$0xff]  ;;  %v482_v29 = vld [vmem:[%s2397_s9 + $0x9c8] sm:$0xff] }
  0x7c   : > { %v484_v30 = vld [vmem:[%s2397_s9 + $0x9e0] sm:$0xff]  ;;  %481 = vst [vmem:[%s2405_s10 + $0x4e0] sm:$0xff] %v480_v28  ;;  %483 = vst [vmem:[%s2405_s10 + $0x4e8] sm:$0xff] %v482_v29  ;;  %v486_v31 = vld [vmem:[%s2397_s9 + $0x9e8] sm:$0xff] }
  0x7d   : > { %485 = vst [vmem:[%s2405_s10 + $0x4f0] sm:$0xff] %v484_v30  ;;  %v488_v32 = vld [vmem:[%s2397_s9 + $0xa00] sm:$0xff]  ;;  %v490_v33 = vld [vmem:[%s2397_s9 + $0xa08] sm:$0xff]  ;;  %487 = vst [vmem:[%s2405_s10 + $0x4f8] sm:$0xff] %v486_v31 }
  0x7e   : > { %489 = vst [vmem:[%s2405_s10 + $0x500] sm:$0xff] %v488_v32  ;;  %491 = vst [vmem:[%s2405_s10 + $0x508] sm:$0xff] %v490_v33  ;;  %v492_v34 = vld [vmem:[%s2397_s9 + $0xa20] sm:$0xff]  ;;  %v494_v35 = vld [vmem:[%s2397_s9 + $0xa28] sm:$0xff] }
  0x7f   : > { %v496_v36 = vld [vmem:[%s2397_s9 + $0xa40] sm:$0xff]  ;;  %493 = vst [vmem:[%s2405_s10 + $0x510] sm:$0xff] %v492_v34  ;;  %495 = vst [vmem:[%s2405_s10 + $0x518] sm:$0xff] %v494_v35  ;;  %v498_v37 = vld [vmem:[%s2397_s9 + $0xa48] sm:$0xff] }
  0x80   : > { %497 = vst [vmem:[%s2405_s10 + $0x520] sm:$0xff] %v496_v36  ;;  %v500_v38 = vld [vmem:[%s2397_s9 + $0xa60] sm:$0xff]  ;;  %v502_v39 = vld [vmem:[%s2397_s9 + $0xa68] sm:$0xff]  ;;  %499 = vst [vmem:[%s2405_s10 + $0x528] sm:$0xff] %v498_v37 }
  0x81   : > { %501 = vst [vmem:[%s2405_s10 + $0x530] sm:$0xff] %v500_v38  ;;  %503 = vst [vmem:[%s2405_s10 + $0x538] sm:$0xff] %v502_v39  ;;  %v504_v40 = vld [vmem:[%s2397_s9 + $0xa80] sm:$0xff]  ;;  %v506_v41 = vld [vmem:[%s2397_s9 + $0xa88] sm:$0xff] }
  0x82   : > { %v508_v42 = vld [vmem:[%s2397_s9 + $0xaa0] sm:$0xff]  ;;  %505 = vst [vmem:[%s2405_s10 + $0x540] sm:$0xff] %v504_v40  ;;  %507 = vst [vmem:[%s2405_s10 + $0x548] sm:$0xff] %v506_v41  ;;  %v510_v43 = vld [vmem:[%s2397_s9 + $0xaa8] sm:$0xff] }
  0x83   : > { %509 = vst [vmem:[%s2405_s10 + $0x550] sm:$0xff] %v508_v42  ;;  %v512_v44 = vld [vmem:[%s2397_s9 + $0xac0] sm:$0xff]  ;;  %v514_v45 = vld [vmem:[%s2397_s9 + $0xac8] sm:$0xff]  ;;  %511 = vst [vmem:[%s2405_s10 + $0x558] sm:$0xff] %v510_v43 }
  0x84   : > { %513 = vst [vmem:[%s2405_s10 + $0x560] sm:$0xff] %v512_v44  ;;  %515 = vst [vmem:[%s2405_s10 + $0x568] sm:$0xff] %v514_v45  ;;  %v516_v46 = vld [vmem:[%s2397_s9 + $0xae0] sm:$0xff]  ;;  %v518_v47 = vld [vmem:[%s2397_s9 + $0xae8] sm:$0xff] }
  0x85   : > { %v520_v48 = vld [vmem:[%s2397_s9 + $0xb00] sm:$0xff]  ;;  %517 = vst [vmem:[%s2405_s10 + $0x570] sm:$0xff] %v516_v46  ;;  %519 = vst [vmem:[%s2405_s10 + $0x578] sm:$0xff] %v518_v47  ;;  %v522_v49 = vld [vmem:[%s2397_s9 + $0xb08] sm:$0xff] }
  0x86   : > { %521 = vst [vmem:[%s2405_s10 + $0x580] sm:$0xff] %v520_v48  ;;  %v524_v50 = vld [vmem:[%s2397_s9 + $0xb20] sm:$0xff]  ;;  %v526_v51 = vld [vmem:[%s2397_s9 + $0xb28] sm:$0xff]  ;;  %523 = vst [vmem:[%s2405_s10 + $0x588] sm:$0xff] %v522_v49 }
  0x87   : > { %525 = vst [vmem:[%s2405_s10 + $0x590] sm:$0xff] %v524_v50  ;;  %527 = vst [vmem:[%s2405_s10 + $0x598] sm:$0xff] %v526_v51  ;;  %v528_v52 = vld [vmem:[%s2397_s9 + $0xb40] sm:$0xff]  ;;  %v530_v53 = vld [vmem:[%s2397_s9 + $0xb48] sm:$0xff] }
  0x88   : > { %v532_v54 = vld [vmem:[%s2397_s9 + $0xb60] sm:$0xff]  ;;  %529 = vst [vmem:[%s2405_s10 + $0x5a0] sm:$0xff] %v528_v52  ;;  %531 = vst [vmem:[%s2405_s10 + $0x5a8] sm:$0xff] %v530_v53  ;;  %v534_v55 = vld [vmem:[%s2397_s9 + $0xb68] sm:$0xff] }
  0x89   : > { %533 = vst [vmem:[%s2405_s10 + $0x5b0] sm:$0xff] %v532_v54  ;;  %v536_v56 = vld [vmem:[%s2397_s9 + $0xb80] sm:$0xff]  ;;  %v538_v57 = vld [vmem:[%s2397_s9 + $0xb88] sm:$0xff]  ;;  %535 = vst [vmem:[%s2405_s10 + $0x5b8] sm:$0xff] %v534_v55 }
  0x8a   : > { %537 = vst [vmem:[%s2405_s10 + $0x5c0] sm:$0xff] %v536_v56  ;;  %539 = vst [vmem:[%s2405_s10 + $0x5c8] sm:$0xff] %v538_v57  ;;  %v540_v58 = vld [vmem:[%s2397_s9 + $0xba0] sm:$0xff]  ;;  %v542_v59 = vld [vmem:[%s2397_s9 + $0xba8] sm:$0xff] }
  0x8b   : > { %v544_v60 = vld [vmem:[%s2397_s9 + $0xbc0] sm:$0xff]  ;;  %541 = vst [vmem:[%s2405_s10 + $0x5d0] sm:$0xff] %v540_v58  ;;  %543 = vst [vmem:[%s2405_s10 + $0x5d8] sm:$0xff] %v542_v59  ;;  %v546_v61 = vld [vmem:[%s2397_s9 + $0xbc8] sm:$0xff] }
  0x8c   : > { %545 = vst [vmem:[%s2405_s10 + $0x5e0] sm:$0xff] %v544_v60  ;;  %v548_v62 = vld [vmem:[%s2397_s9 + $0xbe0] sm:$0xff]  ;;  %v550_v63 = vld [vmem:[%s2397_s9 + $0xbe8] sm:$0xff]  ;;  %547 = vst [vmem:[%s2405_s10 + $0x5e8] sm:$0xff] %v546_v61 }
  0x8d   : > { %549 = vst [vmem:[%s2405_s10 + $0x5f0] sm:$0xff] %v548_v62  ;;  %551 = vst [vmem:[%s2405_s10 + $0x5f8] sm:$0xff] %v550_v63 }
  0x8e PF: > { %560 = sbr.rel (%p2376_p12) target bundleno = 399 (0x18f), region = 47 }
  0x95   : > { %2271 = dma.done.wait (%p2018_p11), [#allocation4], 16  }
  0x96   : > { %2273 = vsyncadd (%p2018_p11), [#allocation4], 4294967280  ;;  %s2792_s11 = sand.u32 1, %s2288_s13  }
  0x97   : > { %s1998_s17 = smul.u32 1536, %s2792_s11 }
  0x99   : > { %s2795_s19 = scalar_lea.vmem [#allocation5], %s1998_s17 }
  0x9a   : > { %573 = sfence }
  0x9b   : > { %v599_v0 = vld [vmem:[%s2795_s19] sm:$0xff]  ;;  %v600_v1 = vld [vmem:[%s2795_s19 + $0x8] sm:$0xff]  ;;  %v601_v2 = vld [vmem:[%s2795_s19 + $0x10] sm:$0xff]  ;;  %s3467_s20 = sld [smem:[#allocation2]]  ;;  %s3469_s22 = sld [smem:[#allocation2 + $0x1]]  ;;  %vm1562_vm2 = vcmask 1040384  }
  0x9c   : > { %v602_v3 = vld [vmem:[%s2795_s19 + $0x18] sm:$0xff]  ;;  %v603_v4 = vld [vmem:[%s2795_s19 + $0x20] sm:$0xff]  ;;  %v604_v5 = vld [vmem:[%s2795_s19 + $0x28] sm:$0xff]  ;;  %v796_v6 = vmul.f32 %v599_v0, %v599_v0  ;;  %v797_v7 = vmul.f32 %v600_v1, %v600_v1  ;;  %v798_v8 = vmul.f32 %v601_v2, %v601_v2  ;;  %s3474_s25 = sld [smem:[#allocation2 + $0x2]]  ;;  %s3484_s26 = sld [smem:[#allocation2 + $0x3]]  ;;  %vm1565_vm3 = vcmask 1041408  }
  0x9d   : > { %v605_v9 = vld [vmem:[%s2795_s19 + $0x30] sm:$0xff]  ;;  %v606_v10 = vld [vmem:[%s2795_s19 + $0x38] sm:$0xff]  ;;  %v607_v11 = vld [vmem:[%s2795_s19 + $0x40] sm:$0xff]  ;;  %v799_v12 = vmul.f32 %v602_v3, %v602_v3  ;;  %v800_v13 = vmul.f32 %v603_v4, %v603_v4  ;;  %v801_v14 = vmul.f32 %v604_v5, %v604_v5  ;;  %v3591_v5 = vlaneseq  ;;  %s3487_s27 = sld [smem:[#allocation2 + $0x4]]  ;;  %s3494_s28 = sld [smem:[#allocation2 + $0x5]] }
  0x9e   : > { %v608_v15 = vld [vmem:[%s2795_s19 + $0x48] sm:$0xff]  ;;  %v802_v16 = vmul.f32 %v605_v9, %v605_v9  ;;  %v828_v17 = vadd.f32 %v798_v8, %v796_v6  ;;  %v609_v18 = vld [vmem:[%s2795_s19 + $0x50] sm:$0xff]  ;;  %v803_v19 = vmul.f32 %v606_v10, %v606_v10  ;;  %v610_v21 = vld [vmem:[%s2795_s19 + $0x58] sm:$0xff]  ;;  %v804_v22 = vmul.f32 %v607_v11, %v607_v11  ;;  %s1788_s29 = sshll.u32 %s2792_s11, 4  ;;  %s1996_s30 = sshll.u32 %s2343_s16, 8 }
  0x9f   : > { %v849_v20 = vadd.f32 %v799_v12, %v797_v7  ;;  %v611_v24 = vld [vmem:[%s2795_s19 + $0x60] sm:$0xff]  ;;  %v805_v25 = vmul.f32 %v608_v15, %v608_v15  ;;  %v612_v27 = vld [vmem:[%s2795_s19 + $0x68] sm:$0xff]  ;;  %v806_v28 = vmul.f32 %v609_v18, %v609_v18  ;;  %v613_v30 = vld [vmem:[%s2795_s19 + $0x70] sm:$0xff]  ;;  %v807_v31 = vmul.f32 %v610_v21, %v610_v21  ;;  %s595_s4 = scalar_lea.vmem [#allocation7], %s1788_s29  ;;  %s1787_s6 = sshll.u32 %s2792_s11, 1 }
  0xa0   : > { %v829_v23 = vadd.f32 %v828_v17, %v800_v13  ;;  %v614_v33 = vld [vmem:[%s2795_s19 + $0x78] sm:$0xff]  ;;  %v808_v34 = vmul.f32 %v611_v24, %v611_v24  ;;  %v615_v36 = vld [vmem:[%s2795_s19 + $0x80] sm:$0xff]  ;;  %v809_v37 = vmul.f32 %v612_v27, %v612_v27  ;;  %v616_v39 = vld [vmem:[%s2795_s19 + $0x88] sm:$0xff]  ;;  %v810_v40 = vmul.f32 %v613_v30, %v613_v30  ;;  %s1670_s5 = sshll.u32 %s595_s4, 4  ;;  %s3507_s9 = scalar_lea.hbm %s3589_s3, %s1996_s30  ;;  %s3509_s5 = int_to_ptr.vmem [resolvable:$true] %s1670_s5 }
  0xa1   : > { %v850_v26 = vadd.f32 %v849_v20, %v801_v14  ;;  %v617_v42 = vld [vmem:[%s2795_s19 + $0x90] sm:$0xff]  ;;  %v811_v43 = vmul.f32 %v614_v33, %v614_v33  ;;  %v618_v45 = vld [vmem:[%s2795_s19 + $0x98] sm:$0xff]  ;;  %v812_v46 = vmul.f32 %v615_v36, %v615_v36  ;;  %v619_v48 = vld [vmem:[%s2795_s19 + $0xa0] sm:$0xff]  ;;  %v813_v49 = vmul.f32 %v616_v39, %v616_v39  ;;  %s1642_s10 = scalar_lea.sflag [#allocation8], %s2792_s11  ;;  %s2198_s17 = scalar_lea.vmem %s3509_s5, 256 }
  0xa2   : > { %v830_v29 = vadd.f32 %v829_v23, %v802_v16  ;;  %v620_v51 = vld [vmem:[%s2795_s19 + $0xa8] sm:$0xff]  ;;  %v814_v52 = vmul.f32 %v617_v42, %v617_v42  ;;  %v621_v54 = vld [vmem:[%s2795_s19 + $0xb0] sm:$0xff]  ;;  %v815_v55 = vmul.f32 %v618_v45, %v618_v45  ;;  %v622_v57 = vld [vmem:[%s2795_s19 + $0xb8] sm:$0xff]  ;;  %v816_v58 = vmul.f32 %v619_v48, %v619_v48  ;;  %p2199_p5 = scmp.ne.s32.totalorder %s3509_s5, %s2198_s17  ;;  %p3650_p10 = scmp.ne.s32.totalorder %s3600_s23, 0 }
  0xa3   : > { %v851_v32 = vadd.f32 %v850_v26, %v803_v19  ;;  %v817_v60 = vmul.f32 %v620_v51, %v620_v51  ;;  %v623_v62 = vld [vmem:[%s2795_s19 + $0xc0] sm:$0xff]  ;;  %v818_v63 = vmul.f32 %v621_v54, %v621_v54  ;;  %v819_v1 = vmul.f32 %v622_v57, %v622_v57  ;;  %v624_v3 = vld [vmem:[%s2795_s19 + $0xc8] sm:$0xff]  ;;  %v625_v6 = vld [vmem:[%s2795_s19 + $0xd0] sm:$0xff] }
  0xa4   : > { %v831_v35 = vadd.f32 %v830_v29, %v804_v22  ;;  %v626_v7 = vld [vmem:[%s2795_s19 + $0xd8] sm:$0xff]  ;;  %v627_v8 = vld [vmem:[%s2795_s19 + $0xe0] sm:$0xff]  ;;  %v820_v9 = vmul.f32 %v623_v62, %v623_v62  ;;  %v628_v11 = vld [vmem:[%s2795_s19 + $0xe8] sm:$0xff]  ;;  %v821_v19 = vmul.f32 %v624_v3, %v624_v3  ;;  %v2853_v24 = vshrl.u32 %v3591_v5, 7  ;;  %p2200_p11 = pnand %p2199_p5, %p3650_p10 }
  0xa5   : > { %v852_v38 = vadd.f32 %v851_v32, %v805_v25  ;;  %v2828_v12 = vld [vmem:[%s2795_s19 + $0x100] sm:$0xff]  ;;  %v2831_v13 = vld [vmem:[%s2795_s19 + $0x108] sm:$0xff]  ;;  %v629_v15 = vld [vmem:[%s2795_s19 + $0xf0] sm:$0xff]  ;;  %v822_v29 = vmul.f32 %v625_v6, %v625_v6  ;;  %v823_v30 = vmul.f32 %v626_v7, %v626_v7  ;;  %v825_v36 = vmul.f32 %v628_v11, %v628_v11 }
  0xa6   : > { %v832_v41 = vadd.f32 %v831_v35, %v806_v28  ;;  %v2835_v16 = vld [vmem:[%s2795_s19 + $0x110] sm:$0xff]  ;;  %v2838_v17 = vld [vmem:[%s2795_s19 + $0x118] sm:$0xff]  ;;  %v2841_v18 = vld [vmem:[%s2795_s19 + $0x120] sm:$0xff]  ;;  %3603 = vst [vmem:[#allocation12_spill] sm:$0xff] %v2853_v24  ;;  %vm904_vm0 = vcmp.lt.s32.totalorder %v2853_v24, 1  ;;  %vm952_vm1 = vcmp.ge.s32.totalorder %v2853_v24, 1  ;;  %p2201_p12 = pneg %p2200_p11 }
  0xa7   : > { %v853_v44 = vadd.f32 %v852_v38, %v807_v31  ;;  %v2844_v21 = vld [vmem:[%s2795_s19 + $0x128] sm:$0xff]  ;;  %v2847_v22 = vld [vmem:[%s2795_s19 + $0x130] sm:$0xff]  ;;  %v2850_v23 = vld [vmem:[%s2795_s19 + $0x138] sm:$0xff]  ;;  %v824_v31 = vmul.f32 %v627_v8, %v627_v8  ;;  %v871_v38 = vrot.slane %v2831_v13, 7  ;;  %v3592_v39 = vrot.slane %v2835_v16, 7 }
  0xa8   : > { %v833_v47 = vadd.f32 %v832_v41, %v808_v34  ;;  %v630_v25 = vld [vmem:[%s2795_s19 + $0xf8] sm:$0xff]  ;;  %v2857_v26 = vld [vmem:[%s2795_s19 + $0x140] sm:$0xff]  ;;  %v2860_v27 = vld [vmem:[%s2795_s19 + $0x148] sm:$0xff]  ;;  %vm1568_vm4 = vcmask 1042432   ;;  %vm1571_vm5 = vcmask 1043456   ;;  %vm1574_vm6 = vcmask 1044480  }
  0xa9   : > { %v854_v50 = vadd.f32 %v853_v44, %v809_v37  ;;  %v2863_v28 = vld [vmem:[%s2795_s19 + $0x150] sm:$0xff]  ;;  %v2866_v33 = vld [vmem:[%s2795_s19 + $0x158] sm:$0xff]  ;;  %v2869_v34 = vld [vmem:[%s2795_s19 + $0x160] sm:$0xff]  ;;  %v870_v37 = vrot.slane %v2828_v12, 7  ;;  %v873_v44 = vrot.slane %v2838_v17, 7 }
  0xaa   : > { %v834_v53 = vadd.f32 %v833_v47, %v810_v40  ;;  %v2872_v35 = vld [vmem:[%s2795_s19 + $0x168] sm:$0xff]  ;;  %v2878_v40 = vld [vmem:[%s2795_s19 + $0x170] sm:$0xff]  ;;  %v2881_v41 = vld [vmem:[%s2795_s19 + $0x178] sm:$0xff] }
  0xab   : > { %v855_v56 = vadd.f32 %v854_v50, %v811_v43  ;;  %v2884_v42 = vld [vmem:[%s2795_s19 + $0x180] sm:$0xff]  ;;  %v2890_v47 = vld [vmem:[%s2795_s19 + $0x188] sm:$0xff]  ;;  %v2893_v48 = vld [vmem:[%s2795_s19 + $0x190] sm:$0xff]  ;;  %v826_v50 = vmul.f32 %v629_v15, %v629_v15 }
  0xac   : > { %v835_v59 = vadd.f32 %v834_v53, %v812_v46  ;;  %v2902_v54 = vld [vmem:[%s2795_s19 + $0x1a0] sm:$0xff]  ;;  %v2917_v62 = vld [vmem:[%s2795_s19 + $0x1d0] sm:$0xff]  ;;  %v2932_v7 = vld [vmem:[%s2795_s19 + $0x1f8] sm:$0xff]  ;;  %v887_v11 = vrot.slane %v2890_v47, 7 }
  0xad   : > { %v856_v61 = vadd.f32 %v855_v56, %v813_v49  ;;  %v2896_v49 = vld [vmem:[%s2795_s19 + $0x198] sm:$0xff]  ;;  %v2908_v56 = vld [vmem:[%s2795_s19 + $0x1e0] sm:$0xff]  ;;  %v2929_v6 = vld [vmem:[%s2795_s19 + $0x1f0] sm:$0xff]  ;;  %3608 = vst [vmem:[#allocation17_spill] sm:$0xff] %v2932_v7  ;;  %v896_v5 = vrot.slane %v2917_v62, 7  ;;  %v901_v46 = vrot.slane %v2932_v7, 7 }
  0xae   : > { %v836_v0 = vadd.f32 %v835_v59, %v814_v52  ;;  %3604 = vst [vmem:[#allocation13_spill] sm:$0xff] %v2908_v56  ;;  %3607 = vst [vmem:[#allocation16_spill] sm:$0xff] %v2929_v6  ;;  %v2941_v15 = vld [vmem:[%s2795_s19 + $0x1c8] sm:$0xff]  ;;  %v900_v51 = vrot.slane %v2929_v6, 7 }
  0xaf   : > { %v857_v2 = vadd.f32 %v856_v61, %v815_v55  ;;  %v2905_v55 = vld [vmem:[%s2795_s19 + $0x1b0] sm:$0xff]  ;;  %v2914_v61 = vld [vmem:[%s2795_s19 + $0x1c0] sm:$0xff] }
  0xb0   : > { %v837_v4 = vadd.f32 %v836_v0, %v816_v58  ;;  %v827_v0 = vmul.f32 %v630_v25, %v630_v25  ;;  %v890_v25 = vrot.slane %v2902_v54, 7  ;;  %v894_v53 = vrot.slane %v2914_v61, 7 }
  0xb1   : > { %v858_v10 = vadd.f32 %v857_v2, %v817_v60  ;;  %v895_v2 = vrot.slane %v2941_v15, 7 }
  0xb2   : > { %v838_v14 = vadd.f32 %v837_v4, %v818_v63  ;;  %v2920_v63 = vld [vmem:[%s2795_s19 + $0x1e8] sm:$0xff]  ;;  %v2926_v4 = vld [vmem:[%s2795_s19 + $0x1d8] sm:$0xff] }
  0xb3   : > { %v859_v20 = vadd.f32 %v858_v10, %v819_v1  ;;  %3605 = vst [vmem:[#allocation14_spill] sm:$0xff] %v2920_v63  ;;  %3606 = vst [vmem:[#allocation15_spill] sm:$0xff] %v2926_v4  ;;  %v886_v10 = vrot.slane %v2884_v42, 7  ;;  %v899_v58 = vrot.slane %v2920_v63, 7  ;;  %v897_v52 = vrot.slane %v2926_v4, 7 }
  0xb4   : > { %v839_v32 = vadd.f32 %v838_v14, %v820_v9  ;;  %v2938_v14 = vld [vmem:[%s2795_s19 + $0x1b8] sm:$0xff]  ;;  %v2980_v9 = vsel %vm904_vm0, %v894_v53, %v896_v5 }
  0xb5   : > { %v860_v43 = vadd.f32 %v859_v20, %v821_v19  ;;  %v888_v19 = vrot.slane %v2893_v48, 7  ;;  %v889_v20 = vrot.slane %v2896_v49, 7  ;;  %v893_v60 = vrot.slane %v2938_v14, 7 }
  0xb6   : > { %v840_v57 = vadd.f32 %v839_v32, %v822_v29  ;;  %v898_v29 = vrot.slane %v2908_v56, 7  ;;  %v2948_v32 = vld [vmem:[%s2795_s19 + $0x1a8] sm:$0xff]  ;;  %v2984_v3 = vsel %vm904_vm0, %v895_v2, %v897_v52 }
  0xb7   : > { %v861_v8 = vadd.f32 %v860_v43, %v823_v30  ;;  %v892_v43 = vrot.slane %v2905_v55, 7  ;;  %3613 = vst [vmem:[#allocation22_spill] sm:$0xff] %v2984_v3 }
  0xb8   : > { %v841_v30 = vadd.f32 %v840_v57, %v824_v31  ;;  %v891_v31 = vrot.slane %v2948_v32, 7  ;;  %v2963_v57 = vsel %vm904_vm0, %v898_v29, %v900_v51  ;;  %v2967_v59 = vsel %vm904_vm0, %v896_v5, %v898_v29 }
  0xb9   : > { %v862_v45 = vadd.f32 %v861_v8, %v825_v36  ;;  %3609 = vst [vmem:[#allocation18_spill] sm:$0xff] %v2963_v57  ;;  %3610 = vst [vmem:[#allocation19_spill] sm:$0xff] %v2967_v59  ;;  %v2972_v36 = vsel %vm904_vm0, %v899_v58, %v901_v46  ;;  %v2976_v8 = vsel %vm904_vm0, %v897_v52, %v899_v58 }
  0xba   : > { %v842_v1 = vadd.f32 %v841_v30, %v826_v50  ;;  %3611 = vst [vmem:[#allocation20_spill] sm:$0xff] %v2972_v36  ;;  %3612 = vst [vmem:[#allocation21_spill] sm:$0xff] %v2976_v8  ;;  %v2988_v29 = vsel %vm904_vm0, %v892_v43, %v894_v53  ;;  %v935_v50 = vsel %vm904_vm0, %v900_v51, %v870_v37  ;;  %v3616_v36 = vrot.slane %v2869_v34, 7 }
  0xbb   : > { %v936_v58 = vsel %vm904_vm0, %v901_v46, %v871_v38  ;;  %v863_v5 = vadd.f32 %v862_v45, %v827_v0  ;;  %v3000_v30 = vsel %vm904_vm0, %v893_v60, %v895_v2  ;;  %v3004_v52 = vsel %vm904_vm0, %v890_v25, %v892_v43 }
  0xbc   : > { %v3008_v53 = vsel %vm904_vm0, %v891_v31, %v893_v60  ;;  %v3012_v51 = vsel %vm904_vm0, %v888_v19, %v890_v25  ;;  %v3016_v46 = vsel %vm904_vm0, %v889_v20, %v891_v31  ;;  %v917_v45 = vsel %vm904_vm0, %v886_v10, %v888_v19 }
  0xbd   : > { %v933_v0 = vsel %vm904_vm0, %v870_v37, %v3592_v39  ;;  %v843_v60 = vrot.slane %v842_v1, 4  ;;  %v934_v2 = vsel %vm904_vm0, %v871_v38, %v873_v44  ;;  %v968_v25 = vsub.f32 %v2828_v12, %v935_v50 }
  0xbe   : > { %v969_v43 = vsub.f32 %v2831_v13, %v936_v58  ;;  %v918_v19 = vsel %vm904_vm0, %v887_v11, %v889_v20  ;;  %v3614_v31 = vrot.slane %v2878_v40, 7  ;;  %v3615_v39 = vrot.slane %v2881_v41, 7 }
  0xbf   : > { %v3617_v38 = vrot.slane %v2863_v28, 7  ;;  %v864_v13 = vrot.slane %v863_v5, 4  ;;  %v3618_v20 = vrot.slane %v2872_v35, 7  ;;  %v3619_v50 = vrot.slane %v2866_v33, 7 }
  0xc0   : > { %v919_v37 = vsel %vm904_vm0, %v3614_v31, %v886_v10  ;;  %v920_v7 = vsel %vm904_vm0, %v3615_v39, %v887_v11  ;;  %v3620_v58 = vrot.slane %v2841_v18, 7  ;;  %v3621_v31 = vrot.slane %v2835_v16, 7 }
  0xc1   : > { %v923_v12 = vsel %vm904_vm0, %v3617_v38, %v3616_v36  ;;  %v924_v10 = vsel %vm904_vm0, %v3619_v50, %v3618_v20  ;;  %v3622_v11 = vrot.slane %v2844_v21, 7  ;;  %v3623_v38 = vrot.slane %v2847_v22, 7 }
  0xc2   : > { %v931_v39 = vsel %vm904_vm0, %v3621_v31, %v3620_v58  ;;  %v3624_v6 = vmov %v3620_v58  ;;  %v3625_v50 = vrot.slane %v2850_v23, 7  ;;  %v970_v31 = vsub.f32 %v2835_v16, %v933_v0 }
  0xc3   : > { %v932_v36 = vsel %vm904_vm0, %v873_v44, %v3622_v11  ;;  %v929_v20 = vsel %vm904_vm0, %v3624_v6, %v3623_v38  ;;  %v3626_v57 = vmov %v3622_v11  ;;  %v971_v63 = vsub.f32 %v2838_v17, %v934_v2 }
  0xc4   : > { %v930_v58 = vsel %vm904_vm0, %v3626_v57, %v3625_v50  ;;  %v844_v8 = vadd.f32 %v843_v60, %v842_v1  ;;  %v3627_v44 = vrot.slane %v2863_v28, 7  ;;  %v3628_v11 = vrot.slane %v2857_v26, 7 }
  0xc5   : > { %v1000_v6 = vsel %vm952_vm1, %v968_v25, 0.0  ;;  %v1001_v38 = vsel %vm952_vm1, %v969_v43, 0.0  ;;  %v3629_v57 = vrot.slane %v2866_v33, 7  ;;  %v3630_v16 = vrot.slane %v2860_v27, 7 }
  0xc6   : > { %v925_v56 = vsel %vm904_vm0, %v3628_v11, %v3627_v44  ;;  %v3631_v1 = vmov %v3628_v11  ;;  %v3632_v0 = vrot.slane %v2847_v22, 7  ;;  %v972_v2 = vsub.f32 %v2841_v18, %v931_v39 }
  0xc7   : > { %v926_v17 = vsel %vm904_vm0, %v3630_v16, %v3629_v57  ;;  %v973_v25 = vsub.f32 %v2844_v21, %v932_v36  ;;  %v865_v50 = vadd.f32 %v864_v13, %v863_v5  ;;  %v3633_v43 = vmov %v3630_v16 }
  0xc8   : > { %v927_v60 = vsel %vm904_vm0, %v3632_v0, %v3631_v1  ;;  %v3634_v44 = vrot.slane %v2850_v23, 7  ;;  %v974_v57 = vsub.f32 %v2847_v22, %v929_v20  ;;  %v975_v16 = vsub.f32 %v2850_v23, %v930_v58 }
  0xc9   : > { %v1032_v59 = vmul.f32 %v1000_v6, %v1000_v6  ;;  %v1033_v4 = vmul.f32 %v1001_v38, %v1001_v38  ;;  %v1034_v3 = vmul.f32 %v970_v31, %v970_v31  ;;  %v1035_v1 = vmul.f32 %v971_v63, %v971_v63 }
  0xca   : > { %v928_v11 = vsel %vm904_vm0, %v3634_v44, %v3633_v43  ;;  %v845_v0 = vrot.slane %v844_v8, 2  ;;  %v3635_v18 = vrot.slane %v2878_v40, 7  ;;  %v3636_v21 = vrot.slane %v2869_v34, 7 }
  0xcb   : > { %v3637_v13 = vrot.slane %v2881_v41, 7  ;;  %v3638_v39 = vrot.slane %v2872_v35, 7  ;;  %v976_v23 = vsub.f32 %v2857_v26, %v927_v60  ;;  %v977_v36 = vsub.f32 %v2860_v27, %v928_v11  ;;  %v3646_v11 = vld [vmem:[#allocation16_spill] sm:$0xff] }
  0xcc   : > { %v921_v5 = vsel %vm904_vm0, %v3636_v21, %v3635_v18  ;;  %v978_v63 = vsub.f32 %v2863_v28, %v925_v56  ;;  %v1036_v20 = vmul.f32 %v972_v2, %v972_v2  ;;  %v1037_v58 = vmul.f32 %v973_v25, %v973_v25  ;;  %v3643_v25 = vld [vmem:[#allocation21_spill] sm:$0xff] }
  0xcd   : > { %v922_v22 = vsel %vm904_vm0, %v3638_v39, %v3637_v13  ;;  %v866_v31 = vrot.slane %v865_v50, 2  ;;  %v979_v6 = vsub.f32 %v2866_v33, %v926_v17  ;;  %v980_v38 = vsub.f32 %v2869_v34, %v923_v12 }
  0xce   : > { %v981_v43 = vsub.f32 %v2872_v35, %v924_v10  ;;  %v1038_v44 = vmul.f32 %v974_v57, %v974_v57  ;;  %v1039_v18 = vmul.f32 %v975_v16, %v975_v16  ;;  %v1064_v21 = vadd.f32 %v1034_v3, %v1032_v59  ;;  %v1821_v16 = vld [vmem:[%s2795_s19 + $0x200] sm:$0xff] }
  0xcf   : > { %v1085_v24 = vadd.f32 %v1035_v1, %v1033_v4  ;;  %v3132_v13 = vadd.f32 %v845_v0, %v844_v8  ;;  %v982_v26 = vsub.f32 %v2878_v40, %v921_v5  ;;  %v983_v27 = vsub.f32 %v2881_v41, %v922_v22  ;;  %v1823_v1 = vld [vmem:[%s2795_s19 + $0x210] sm:$0xff] }
  0xd0   : > { %v984_v28 = vsub.f32 %v2884_v42, %v919_v37  ;;  %v1040_v56 = vmul.f32 %v976_v23, %v976_v23  ;;  %v1041_v60 = vmul.f32 %v977_v36, %v977_v36  ;;  %v1065_v2 = vadd.f32 %v1064_v21, %v1036_v20  ;;  %v1822_v23 = vld [vmem:[%s2795_s19 + $0x208] sm:$0xff]  ;;  %v1824_v36 = vld [vmem:[%s2795_s19 + $0x218] sm:$0xff] }
  0xd1   : > { %v1086_v33 = vadd.f32 %v1085_v24, %v1037_v58  ;;  %v3137_v17 = vadd.f32 %v866_v31, %v865_v50  ;;  %v985_v34 = vsub.f32 %v2890_v47, %v920_v7  ;;  %v986_v35 = vsub.f32 %v2893_v48, %v917_v45  ;;  %v3644_v50 = vld [vmem:[#allocation14_spill] sm:$0xff]  ;;  %v1826_v21 = vld [vmem:[%s2795_s19 + $0x228] sm:$0xff] }
  0xd2   : > { %v987_v59 = vsub.f32 %v2896_v49, %v918_v19  ;;  %v1042_v3 = vmul.f32 %v978_v63, %v978_v63  ;;  %v1043_v4 = vmul.f32 %v979_v6, %v979_v6  ;;  %v1066_v8 = vadd.f32 %v1065_v2, %v1038_v44  ;;  %v1825_v6 = vld [vmem:[%s2795_s19 + $0x220] sm:$0xff]  ;;  %v1827_v2 = vld [vmem:[%s2795_s19 + $0x230] sm:$0xff] }
  0xd3   : > { %v1087_v40 = vadd.f32 %v1086_v33, %v1039_v18  ;;  %v847_v41 = vrot.slane %v3132_v13, 1  ;;  %v988_v42 = vsub.f32 %v2902_v54, %v3012_v51  ;;  %v989_v24 = vsub.f32 %v2948_v32, %v3016_v46  ;;  %v3639_v51 = vld [vmem:[#allocation22_spill] sm:$0xff]  ;;  %v3640_v46 = vld [vmem:[#allocation15_spill] sm:$0xff] }
  0xd4   : > { %v990_v37 = vsub.f32 %v2905_v55, %v3004_v52  ;;  %v991_v47 = vsub.f32 %v2938_v14, %v3008_v53  ;;  %v1044_v48 = vmul.f32 %v980_v38, %v980_v38  ;;  %v1067_v49 = vadd.f32 %v1066_v8, %v1040_v56  ;;  %v3641_v52 = vld [vmem:[#allocation19_spill] sm:$0xff]  ;;  %v3642_v14 = vld [vmem:[#allocation13_spill] sm:$0xff] }
  0xd5   : > { %v1088_v7 = vadd.f32 %v1087_v40, %v1041_v60  ;;  %v992_v45 = vsub.f32 %v2914_v61, %v2988_v29  ;;  %v993_v54 = vsub.f32 %v2941_v15, %v3000_v30  ;;  %v994_v32 = vsub.f32 %v2917_v62, %v2980_v9  ;;  %v3645_v29 = vld [vmem:[#allocation18_spill] sm:$0xff]  ;;  %v3647_v30 = vld [vmem:[#allocation20_spill] sm:$0xff]  ;;  %v3648_v62 = vld [vmem:[#allocation17_spill] sm:$0xff] }
  0xd6   : > { %v995_v55 = vsub.f32 %v3640_v46, %v3639_v51  ;;  %v996_v53 = vsub.f32 %v3642_v14, %v3641_v52  ;;  %v1045_v19 = vmul.f32 %v981_v43, %v981_v43  ;;  %v1068_v12 = vadd.f32 %v1067_v49, %v1042_v3  ;;  %v1828_v33 = vld [vmem:[%s2795_s19 + $0x238] sm:$0xff]  ;;  %v1834_v51 = vld [vmem:[%s2795_s19 + $0x268] sm:$0xff] }
  0xd7   : > { %v1089_v10 = vadd.f32 %v1088_v7, %v1043_v4  ;;  %v997_v61 = vsub.f32 %v3644_v50, %v3643_v25  ;;  %v998_v15 = vsub.f32 %v3646_v11, %v3645_v29  ;;  %v999_v9 = vsub.f32 %v3648_v62, %v3647_v30  ;;  %v1829_v4 = vld [vmem:[%s2795_s19 + $0x240] sm:$0xff]  ;;  %v1838_v62 = vld [vmem:[%s2795_s19 + $0x288] sm:$0xff] }
  0xd8   : > { %v1046_v57 = vmul.f32 %v982_v26, %v982_v26  ;;  %v1047_v0 = vmul.f32 %v983_v27, %v983_v27  ;;  %v1048_v5 = vmul.f32 %v984_v28, %v984_v28  ;;  %v1049_v39 = vmul.f32 %v985_v34, %v985_v34  ;;  %v1885_v26 = vld [vmem:[%s2795_s19 + $0x400] sm:$0xff] }
  0xd9   : > { %v1069_v22 = vadd.f32 %v1068_v12, %v1044_v48  ;;  %v3171_v63 = vmul.f32 %v986_v35, %v986_v35  ;;  %v3173_v20 = vmul.f32 %v987_v59, %v987_v59  ;;  %v3175_v58 = vmul.f32 %v988_v42, %v988_v42  ;;  %v1832_v48 = vld [vmem:[%s2795_s19 + $0x258] sm:$0xff] }
  0xda   : > { %v3177_v31 = vmul.f32 %v989_v24, %v989_v24  ;;  %v3180_v38 = vmul.f32 %v990_v37, %v990_v37  ;;  %v3182_v43 = vmul.f32 %v991_v47, %v991_v47  ;;  %v3184_v44 = vmul.f32 %v992_v45, %v992_v45  ;;  %v1830_v37 = vld [vmem:[%s2795_s19 + $0x248] sm:$0xff]  ;;  %v1831_v47 = vld [vmem:[%s2795_s19 + $0x250] sm:$0xff] }
  0xdb   : > { %v1090_v18 = vadd.f32 %v1089_v10, %v1045_v19  ;;  %v3188_v27 = vmul.f32 %v993_v54, %v993_v54  ;;  %v3190_v28 = vmul.f32 %v994_v32, %v994_v32  ;;  %v1949_v56 = vadd.f32 -10.0, %v1821_v16  ;;  %v1833_v32 = vld [vmem:[%s2795_s19 + $0x260] sm:$0xff]  ;;  %v1836_v19 = vld [vmem:[%s2795_s19 + $0x278] sm:$0xff] }
  0xdc   : > { %v1951_v60 = vadd.f32 -10.0, %v1823_v1  ;;  %v3194_v34 = vmul.f32 %v995_v55, %v995_v55  ;;  %v1070_v35 = vadd.f32 %v1069_v22, %v1046_v57  ;;  %v1950_v59 = vadd.f32 -10.0, %v1822_v23  ;;  %v1840_v22 = vld [vmem:[%s2795_s19 + $0x298] sm:$0xff] }
  0xdd   : > { %v1952_v3 = vadd.f32 -10.0, %v1824_v36  ;;  %v3197_v8 = vmul.f32 %v996_v53, %v996_v53  ;;  %v3199_v40 = vmul.f32 %v997_v61, %v997_v61  ;;  %v3201_v42 = vmul.f32 %v998_v15, %v998_v15  ;;  %v1835_v53 = vld [vmem:[%s2795_s19 + $0x270] sm:$0xff]  ;;  %v1837_v61 = vld [vmem:[%s2795_s19 + $0x280] sm:$0xff] }
  0xde   : > { %v1953_v24 = vadd.f32 -10.0, %v1825_v6  ;;  %v3206_v49 = vmul.f32 %v999_v9, %v999_v9  ;;  %v1091_v7 = vadd.f32 %v1090_v18, %v1047_v0  ;;  %v1954_v45 = vadd.f32 -10.0, %v1826_v21  ;;  %v1839_v9 = vld [vmem:[%s2795_s19 + $0x290] sm:$0xff]  ;;  %v1841_v18 = vld [vmem:[%s2795_s19 + $0x2a0] sm:$0xff]  ;;  %v1842_v21 = vld [vmem:[%s2795_s19 + $0x2a8] sm:$0xff] }
  0xdf   : > { %v3208_v54 = vmul.f32 %v1885_v26, %v1885_v26  ;;  %v1955_v46 = vadd.f32 -10.0, %v1827_v2  ;;  %v1956_v55 = vadd.f32 -10.0, %v1828_v33  ;;  %v1138_v52 = vmul.f32 %v1949_v56, %v1949_v56  ;;  %v1843_v33 = vld [vmem:[%s2795_s19 + $0x2b0] sm:$0xff] }
  0xe0   : > { %v1140_v14 = vmul.f32 %v1951_v60, %v1951_v60  ;;  %v1071_v12 = vadd.f32 %v1070_v35, %v1048_v5  ;;  %v1957_v10 = vadd.f32 -10.0, %v1829_v4  ;;  %v1139_v25 = vmul.f32 %v1950_v59, %v1950_v59  ;;  %v1844_v4 = vld [vmem:[%s2795_s19 + $0x2b8] sm:$0xff] }
  0xe1   : > { %v1141_v50 = vmul.f32 %v1952_v3, %v1952_v3  ;;  %v1958_v29 = vadd.f32 -10.0, %v1830_v37  ;;  %v1959_v11 = vadd.f32 -10.0, %v1831_v47  ;;  %v1960_v15 = vadd.f32 -10.0, %v1832_v48 }
  0xe2   : > { %v1142_v30 = vmul.f32 %v1953_v24, %v1953_v24  ;;  %v1092_v57 = vadd.f32 %v1091_v7, %v1049_v39  ;;  %v1961_v16 = vadd.f32 -10.0, %v1833_v32  ;;  %v1962_v1 = vadd.f32 -10.0, %v1834_v51  ;;  %v1845_v24 = vld [vmem:[%s2795_s19 + $0x2c0] sm:$0xff] }
  0xe3   : > { %v1143_v0 = vmul.f32 %v1954_v45, %v1954_v45  ;;  %v1963_v5 = vadd.f32 -10.0, %v1835_v53  ;;  %v1964_v23 = vadd.f32 -10.0, %v1836_v19  ;;  %v1144_v36 = vmul.f32 %v1955_v46, %v1955_v46  ;;  %v1846_v45 = vld [vmem:[%s2795_s19 + $0x2c8] sm:$0xff] }
  0xe4   : > { %v1170_v6 = vadd.f32 %v1140_v14, %v1138_v52  ;;  %v1072_v26 = vadd.f32 %v1071_v12, %v3171_v63  ;;  %v1965_v56 = vadd.f32 -10.0, %v1837_v61  ;;  %v1145_v60 = vmul.f32 %v1956_v55, %v1956_v55  ;;  %v1847_v55 = vld [vmem:[%s2795_s19 + $0x2d0] sm:$0xff]  ;;  %v1848_v52 = vld [vmem:[%s2795_s19 + $0x2d8] sm:$0xff] }
  0xe5   : > { %v1191_v2 = vadd.f32 %v1141_v50, %v1139_v25  ;;  %v1966_v39 = vadd.f32 -10.0, %v1838_v62  ;;  %v1967_v35 = vadd.f32 -10.0, %v1839_v9  ;;  %v1146_v59 = vmul.f32 %v1957_v10, %v1957_v10  ;;  %v1849_v10 = vld [vmem:[%s2795_s19 + $0x2e0] sm:$0xff] }
  0xe6   : > { %v1171_v3 = vadd.f32 %v1170_v6, %v1142_v30  ;;  %v1093_v37 = vadd.f32 %v1092_v57, %v3173_v20  ;;  %v1968_v47 = vadd.f32 -10.0, %v1840_v22  ;;  %v1147_v48 = vmul.f32 %v1958_v29, %v1958_v29  ;;  %v1850_v29 = vld [vmem:[%s2795_s19 + $0x2e8] sm:$0xff]  ;;  %v1851_v30 = vld [vmem:[%s2795_s19 + $0x2f0] sm:$0xff] }
  0xe7   : > { %v1192_v7 = vadd.f32 %v1191_v2, %v1143_v0  ;;  %v1969_v63 = vadd.f32 -10.0, %v1841_v18  ;;  %v1970_v32 = vadd.f32 -10.0, %v1842_v21  ;;  %v1148_v51 = vmul.f32 %v1959_v11, %v1959_v11  ;;  %v1853_v21 = vld [vmem:[%s2795_s19 + $0x300] sm:$0xff]  ;;  %v1854_v2 = vld [vmem:[%s2795_s19 + $0x308] sm:$0xff] }
  0xe8   : > { %v1172_v46 = vadd.f32 %v1171_v3, %v1144_v36  ;;  %v1073_v14 = vadd.f32 %v1072_v26, %v3175_v58  ;;  %v1971_v53 = vadd.f32 -10.0, %v1843_v33  ;;  %v1149_v19 = vmul.f32 %v1960_v15, %v1960_v15  ;;  %v1855_v33 = vld [vmem:[%s2795_s19 + $0x310] sm:$0xff] }
  0xe9   : > { %v1193_v12 = vadd.f32 %v1192_v7, %v1145_v60  ;;  %v1972_v25 = vadd.f32 -10.0, %v1844_v4  ;;  %v1973_v20 = vadd.f32 -10.0, %v1845_v24  ;;  %v1150_v50 = vmul.f32 %v1961_v16, %v1961_v16  ;;  %v1857_v7 = vld [vmem:[%s2795_s19 + $0x320] sm:$0xff] }
  0xea   : > { %v1173_v61 = vadd.f32 %v1172_v46, %v1146_v59  ;;  %v1094_v62 = vadd.f32 %v1093_v37, %v3177_v31  ;;  %v1974_v9 = vadd.f32 -10.0, %v1846_v45  ;;  %v1151_v11 = vmul.f32 %v1962_v1, %v1962_v1  ;;  %v1858_v45 = vld [vmem:[%s2795_s19 + $0x328] sm:$0xff] }
  0xeb   : > { %v1194_v57 = vadd.f32 %v1193_v12, %v1147_v48  ;;  %v3233_v58 = vadd.f32 -10.0, %v1847_v55  ;;  %v3235_v15 = vadd.f32 -10.0, %v1848_v52  ;;  %v1152_v0 = vmul.f32 %v1963_v5, %v1963_v5  ;;  %v1856_v5 = vld [vmem:[%s2795_s19 + $0x318] sm:$0xff]  ;;  %v1859_v52 = vld [vmem:[%s2795_s19 + $0x330] sm:$0xff] }
  0xec   : > { %v1174_v22 = vadd.f32 %v1173_v61, %v1148_v51  ;;  %v1074_v16 = vadd.f32 %v1073_v14, %v3180_v38  ;;  %v3238_v36 = vadd.f32 -10.0, %v1849_v10  ;;  %v1153_v6 = vmul.f32 %v1964_v23, %v1964_v23  ;;  %v1860_v14 = vld [vmem:[%s2795_s19 + $0x338] sm:$0xff]  ;;  %v1861_v10 = vld [vmem:[%s2795_s19 + $0x340] sm:$0xff] }
  0xed   : > { %v1195_v18 = vadd.f32 %v1194_v57, %v1149_v19  ;;  %v3241_v31 = vadd.f32 -10.0, %v1850_v29  ;;  %v3243_v1 = vadd.f32 -10.0, %v1851_v30  ;;  %v1154_v26 = vmul.f32 %v1965_v56, %v1965_v56  ;;  %v1862_v29 = vld [vmem:[%s2795_s19 + $0x348] sm:$0xff]  ;;  %v1863_v30 = vld [vmem:[%s2795_s19 + $0x350] sm:$0xff] }
  0xee   : > { %v1175_v60 = vadd.f32 %v1174_v22, %v1150_v50  ;;  %v1095_v38 = vadd.f32 %v1094_v62, %v3182_v43  ;;  %v1155_v59 = vmul.f32 %v1966_v39, %v1966_v39  ;;  %v1156_v3 = vmul.f32 %v1967_v35, %v1967_v35 }
  0xef   : > { %v1196_v23 = vadd.f32 %v1195_v18, %v1151_v11  ;;  %v1157_v4 = vmul.f32 %v1968_v47, %v1968_v47  ;;  %v1158_v24 = vmul.f32 %v1969_v63, %v1969_v63  ;;  %v1159_v37 = vmul.f32 %v1970_v32, %v1970_v32 }
  0xf0   : > { %v1176_v48 = vadd.f32 %v1175_v60, %v1152_v0  ;;  %v1075_v56 = vadd.f32 %v1074_v16, %v3184_v44  ;;  %v1160_v51 = vmul.f32 %v1971_v53, %v1971_v53  ;;  %v1212_v55 = vsub.f32 0.0, %v1853_v21  ;;  %v1864_v16 = vld [vmem:[%s2795_s19 + $0x358] sm:$0xff]  ;;  %v1865_v21 = vld [vmem:[%s2795_s19 + $0x360] sm:$0xff] }
  0xf1   : > { %v1197_v46 = vadd.f32 %v1196_v23, %v1153_v6  ;;  %v1213_v39 = vsub.f32 0.0, %v1854_v2  ;;  %v1214_v35 = vsub.f32 0.0, %v1855_v33  ;;  %v1215_v19 = vsub.f32 0.0, %v1856_v5  ;;  %v1866_v2 = vld [vmem:[%s2795_s19 + $0x368] sm:$0xff] }
  0xf2   : > { %v1177_v43 = vadd.f32 %v1176_v48, %v1154_v26  ;;  %v1096_v47 = vadd.f32 %v1095_v38, %v3188_v27  ;;  %v1161_v63 = vmul.f32 %v1972_v25, %v1972_v25  ;;  %v1162_v32 = vmul.f32 %v1973_v20, %v1973_v20 }
  0xf3   : > { %v1198_v12 = vadd.f32 %v1197_v46, %v1155_v59  ;;  %v3256_v50 = vmul.f32 %v1974_v9, %v1974_v9  ;;  %v1216_v53 = vsub.f32 0.0, %v1857_v7  ;;  %v1217_v61 = vsub.f32 0.0, %v1858_v45  ;;  %v1867_v59 = vld [vmem:[%s2795_s19 + $0x370] sm:$0xff]  ;;  %v1852_v46 = vld [vmem:[%s2795_s19 + $0x2f8] sm:$0xff] }
  0xf4   : > { %v1178_v44 = vadd.f32 %v1177_v43, %v1156_v3  ;;  %v1076_v62 = vadd.f32 %v1075_v56, %v3190_v28  ;;  %v1218_v11 = vsub.f32 0.0, %v1859_v52  ;;  %v1219_v57 = vsub.f32 0.0, %v1860_v14  ;;  %v1870_v43 = vld [vmem:[%s2795_s19 + $0x388] sm:$0xff] }
  0xf5   : > { %v1244_v0 = vmul.f32 1.442695, %v1212_v55  ;;  %v1199_v27 = vadd.f32 %v1198_v12, %v1157_v4  ;;  %v1246_v25 = vmul.f32 1.442695, %v1213_v39  ;;  %v1248_v20 = vmul.f32 1.442695, %v1214_v35 }
  0xf6   : > { %v1250_v22 = vmul.f32 1.442695, %v1215_v19  ;;  %v1097_v9 = vadd.f32 %v1096_v47, %v3194_v34  ;;  %v1179_v6 = vadd.f32 %v1178_v44, %v1158_v24  ;;  %v1220_v18 = vsub.f32 0.0, %v1861_v10  ;;  %v1868_v4 = vld [vmem:[%s2795_s19 + $0x378] sm:$0xff]  ;;  %v1869_v55 = vld [vmem:[%s2795_s19 + $0x380] sm:$0xff] }
  0xf7   : > { %2055 = vpow2.f32 %v1244_v0  ;;  %v1221_v26 = vsub.f32 0.0, %v1862_v29  ;;  %v1252_v28 = vmul.f32 1.442695, %v1216_v53  ;;  %v1254_v60 = vmul.f32 1.442695, %v1217_v61  ;;  %v1871_v53 = vld [vmem:[%s2795_s19 + $0x390] sm:$0xff] }
  0xf8   : > { %2057 = vpow2.f32 %v1246_v25  ;;  %v1077_v33 = vadd.f32 %v1076_v62, %v3197_v8  ;;  %v1222_v5 = vsub.f32 0.0, %v1863_v30  ;;  %v1256_v38 = vmul.f32 1.442695, %v1218_v11  ;;  %v1872_v62 = vld [vmem:[%s2795_s19 + $0x398] sm:$0xff] }
  0xf9   : > { %2059 = vpow2.f32 %v1248_v20  ;;  %v1200_v3 = vadd.f32 %v1199_v27, %v1159_v37  ;;  %v1223_v34 = vsub.f32 0.0, %v1864_v16  ;;  %v1258_v23 = vmul.f32 1.442695, %v1219_v57  ;;  %v1873_v20 = vld [vmem:[%s2795_s19 + $0x3a0] sm:$0xff] }
  0xfa   : > { %2061 = vpow2.f32 %v1250_v22  ;;  %v1180_v24 = vadd.f32 %v1179_v6, %v1160_v51  ;;  %v1224_v48 = vsub.f32 0.0, %v1865_v21  ;;  %v1260_v7 = vmul.f32 1.442695, %v1220_v18 }
  0xfb   : > { %2063 = vpow2.f32 %v1252_v28  ;;  %v1164_v45 = vmul.f32 %v3233_v58, %v3233_v58  ;;  %v1225_v8 = vsub.f32 0.0, %v1866_v2  ;;  %v1262_v56 = vmul.f32 1.442695, %v1221_v26  ;;  %v1874_v26 = vld [vmem:[%s2795_s19 + $0x3a8] sm:$0xff] }
  0xfc   : > { %2065 = vpow2.f32 %v1254_v60  ;;  %v1098_v52 = vadd.f32 %v1097_v9, %v3199_v40  ;;  %v1226_v37 = vsub.f32 0.0, %v1867_v59  ;;  %v1264_v14 = vmul.f32 1.442695, %v1222_v5 }
  0xfd   : > { %2067 = vpow2.f32 %v1256_v38  ;;  %v1201_v39 = vadd.f32 %v1200_v3, %v1161_v63  ;;  %v1227_v51 = vsub.f32 0.0, %v1868_v4  ;;  %v1266_v35 = vmul.f32 1.442695, %v1223_v34  ;;  %v1875_v3 = vld [vmem:[%s2795_s19 + $0x3b0] sm:$0xff]  ;;  %v1876_v34 = vld [vmem:[%s2795_s19 + $0x3b8] sm:$0xff] }
  0xfe   : > { %2069 = vpow2.f32 %v1258_v23  ;;  %v1078_v19 = vadd.f32 %v1077_v33, %v3201_v42  ;;  %v1181_v58 = vadd.f32 %v1180_v24, %v1162_v32  ;;  %v1268_v47 = vmul.f32 1.442695, %v1224_v48 }
  0xff   : > { %2071 = vpow2.f32 %v1260_v7  ;;  %v1980_v12 = vadd.f32 -10.0, %v1852_v46  ;;  %v1228_v10 = vsub.f32 0.0, %v1869_v55  ;;  %v1270_v44 = vmul.f32 1.442695, %v1225_v8 }
 0x100   : > { %2073 = vpow2.f32 %v1262_v56  ;;  %v1099_v61 = vadd.f32 %v1098_v52, %v3206_v49  ;;  %v1229_v29 = vsub.f32 0.0, %v1870_v43  ;;  %v1272_v63 = vmul.f32 1.442695, %v1226_v37  ;;  %v1877_v56 = vld [vmem:[%s2795_s19 + $0x3c0] sm:$0xff]  ;;  %v1878_v43 = vld [vmem:[%s2795_s19 + $0x3c8] sm:$0xff] }
 0x101   : > { %v2056_v40 = vpop.eup %2055  ;;  %2075 = vpow2.f32 %v1264_v14  ;;  %v1165_v42 = vmul.f32 %v3235_v15, %v3235_v15  ;;  %v1202_v32 = vadd.f32 %v1201_v39, %v3256_v50  ;;  %v1274_v11 = vmul.f32 1.442695, %v1227_v51 }
 0x102   : > { %v2058_v30 = vpop.eup %2057  ;;  %2077 = vpow2.f32 %v1266_v35  ;;  %v1079_v0 = vrot.slane %v1078_v19, 4  ;;  %v1166_v27 = vmul.f32 %v3238_v36, %v3238_v36  ;;  %v1182_v49 = vadd.f32 %v1181_v58, %v1164_v45 }
 0x103   : > { %v2060_v57 = vpop.eup %2059  ;;  %2079 = vpow2.f32 %v1268_v47  ;;  %v1167_v22 = vmul.f32 %v3241_v31, %v3241_v31  ;;  %v1230_v16 = vsub.f32 0.0, %v1871_v53  ;;  %v1276_v15 = vmul.f32 1.442695, %v1228_v10  ;;  %v1879_v47 = vld [vmem:[%s2795_s19 + $0x3d0] sm:$0xff]  ;;  %v1880_v10 = vld [vmem:[%s2795_s19 + $0x3d8] sm:$0xff] }
 0x104   : > { %v2062_v25 = vpop.eup %2061  ;;  %2081 = vpow2.f32 %v1270_v44  ;;  %v1100_v50 = vrot.slane %v1099_v61, 4  ;;  %v1231_v6 = vsub.f32 0.0, %v1872_v62  ;;  %v1278_v18 = vmul.f32 1.442695, %v1229_v29  ;;  %v1881_v44 = vld [vmem:[%s2795_s19 + $0x3e0] sm:$0xff] }
 0x105   : > { %v2064_v9 = vpop.eup %2063  ;;  %2083 = vpow2.f32 %v1272_v63  ;;  %v1203_v36 = vadd.f32 %v1202_v32, %v1165_v42  ;;  %v1308_v28 = vadd.f32 %v2060_v57, %v2056_v40  ;;  %v1329_v60 = vadd.f32 %v2062_v25, %v2058_v30  ;;  %v1882_v42 = vld [vmem:[%s2795_s19 + $0x3e8] sm:$0xff]  ;;  %v1883_v32 = vld [vmem:[%s2795_s19 + $0x3f0] sm:$0xff]  ;;  %v1884_v25 = vld [vmem:[%s2795_s19 + $0x3f8] sm:$0xff] }
 0x106   : > { %v2066_v21 = vpop.eup %2065  ;;  %2085 = vpow2.f32 %v1274_v11  ;;  %v3287_v33 = vadd.f32 %v1079_v0, %v1078_v19  ;;  %v1168_v31 = vmul.f32 %v3243_v1, %v3243_v1  ;;  %v1183_v5 = vadd.f32 %v1182_v49, %v1166_v27 }
 0x107   : > { %v2068_v2 = vpop.eup %2067  ;;  %v1232_v38 = vsub.f32 0.0, %v1873_v20  ;;  %2087 = vpow2.f32 %v1276_v15  ;;  %v1280_v23 = vmul.f32 1.442695, %v1230_v16  ;;  %v1309_v4 = vadd.f32 %v2064_v9, %v1308_v28 }
 0x108   : > { %v2070_v59 = vpop.eup %2069  ;;  %v1330_v24 = vadd.f32 %v2066_v21, %v1329_v60  ;;  %v3293_v7 = vadd.f32 %v1100_v50, %v1099_v61  ;;  %v1233_v45 = vsub.f32 0.0, %v1874_v26  ;;  %2089 = vpow2.f32 %v1278_v18  ;;  %v1886_v21 = vld [vmem:[%s2795_s19 + $0x408] sm:$0xff] }
 0x109   : > { %v2072_v48 = vpop.eup %2071  ;;  %v1282_v8 = vmul.f32 1.442695, %v1231_v6  ;;  %v1169_v46 = vmul.f32 %v1980_v12, %v1980_v12  ;;  %v1204_v55 = vadd.f32 %v1203_v36, %v1167_v22  ;;  %v1310_v52 = vadd.f32 %v2068_v2, %v1309_v4  ;;  %v1887_v2 = vld [vmem:[%s2795_s19 + $0x410] sm:$0xff] }
 0x10a   : > { %v2074_v1 = vpop.eup %2073  ;;  %v1331_v37 = vadd.f32 %v2070_v59, %v1330_v24  ;;  %v1081_v39 = vrot.slane %v3287_v33, 2  ;;  %v1184_v51 = vadd.f32 %v1183_v5, %v1168_v31  ;;  %v1234_v35 = vsub.f32 0.0, %v1875_v3  ;;  %v1888_v31 = vld [vmem:[%s2795_s19 + $0x418] sm:$0xff] }
 0x10b   : > { %v2076_v14 = vpop.eup %2075  ;;  %v1235_v19 = vsub.f32 0.0, %v1876_v34  ;;  %2091 = vpow2.f32 %v1280_v23  ;;  %v1284_v40 = vmul.f32 1.442695, %v1232_v38  ;;  %v1311_v12 = vadd.f32 %v2072_v48, %v1310_v52  ;;  %v1892_v52 = vld [vmem:[%s2795_s19 + $0x438] sm:$0xff] }
 0x10c   : > { %v2078_v58 = vpop.eup %2077  ;;  %v1332_v53 = vadd.f32 %v2074_v1, %v1331_v37  ;;  %v1102_v29 = vrot.slane %v3293_v7, 2  ;;  %v1236_v63 = vsub.f32 0.0, %v1877_v56  ;;  %2093 = vpow2.f32 %v1282_v8  ;;  %v1890_v8 = vld [vmem:[%s2795_s19 + $0x428] sm:$0xff] }
 0x10d   : > { %v2080_v61 = vpop.eup %2079  ;;  %v1286_v30 = vmul.f32 1.442695, %v1233_v45  ;;  %v1205_v11 = vadd.f32 %v1204_v55, %v1169_v46  ;;  %v1237_v57 = vsub.f32 0.0, %v1878_v43  ;;  %v1312_v0 = vadd.f32 %v2076_v14, %v1311_v12  ;;  %v1889_v45 = vld [vmem:[%s2795_s19 + $0x420] sm:$0xff]  ;;  %v1891_v55 = vld [vmem:[%s2795_s19 + $0x430] sm:$0xff] }
 0x10e   : > { %v2082_v62 = vpop.eup %2081  ;;  %v1333_v27 = vadd.f32 %v2078_v58, %v1332_v53  ;;  %v1238_v20 = vsub.f32 0.0, %v1879_v47  ;;  %v1239_v22 = vsub.f32 0.0, %v1880_v10  ;;  %v1240_v16 = vsub.f32 0.0, %v1881_v44  ;;  %v1893_v47 = vld [vmem:[%s2795_s19 + $0x440] sm:$0xff]  ;;  %v1894_v10 = vld [vmem:[%s2795_s19 + $0x448] sm:$0xff] }
 0x10f   : > { %v2084_v49 = vpop.eup %2083  ;;  %v1288_v15 = vmul.f32 1.442695, %v1234_v35  ;;  %v1185_v50 = vrot.slane %v1184_v51, 4  ;;  %2095 = vpow2.f32 %v1284_v40  ;;  %v1313_v6 = vadd.f32 %v2080_v61, %v1312_v0  ;;  %v1895_v61 = vld [vmem:[%s2795_s19 + $0x450] sm:$0xff] }
 0x110   : > { %v2086_v9 = vpop.eup %2085  ;;  %v1334_v18 = vadd.f32 %v2082_v62, %v1333_v27  ;;  %v1241_v26 = vsub.f32 0.0, %v1882_v42  ;;  %v1242_v36 = vsub.f32 0.0, %v1883_v32  ;;  %2097 = vpow2.f32 %v1286_v30  ;;  %v1897_v32 = vld [vmem:[%s2795_s19 + $0x460] sm:$0xff] }
 0x111   : > { %v1290_v28 = vmul.f32 1.442695, %v1235_v19  ;;  %v2088_v60 = vpop.eup %2087  ;;  %v1206_v5 = vrot.slane %v1205_v11, 4  ;;  %v1243_v38 = vsub.f32 0.0, %v1884_v25  ;;  %v1314_v59 = vadd.f32 %v2084_v49, %v1313_v6  ;;  %v1901_v6 = vld [vmem:[%s2795_s19 + $0x480] sm:$0xff] }
 0x112   : > { %v1335_v3 = vadd.f32 %v2086_v9, %v1334_v18  ;;  %v2090_v34 = vpop.eup %2089  ;;  %v3309_v23 = vadd.f32 %v1081_v39, %v3287_v33  ;;  %v1292_v4 = vmul.f32 1.442695, %v1236_v63  ;;  %v1294_v24 = vmul.f32 1.442695, %v1237_v57  ;;  %v1896_v63 = vld [vmem:[%s2795_s19 + $0x458] sm:$0xff]  ;;  %v1899_v57 = vld [vmem:[%s2795_s19 + $0x470] sm:$0xff] }
 0x113   : > { %v1296_v48 = vmul.f32 1.442695, %v1238_v20  ;;  %v3313_v1 = vadd.f32 %v1185_v50, %v1184_v51  ;;  %2099 = vpow2.f32 %v1288_v15  ;;  %v1298_v56 = vmul.f32 1.442695, %v1239_v22  ;;  %v1900_v50 = vld [vmem:[%s2795_s19 + $0x478] sm:$0xff]  ;;  %v1902_v18 = vld [vmem:[%s2795_s19 + $0x488] sm:$0xff] }
 0x114   : > { %v1351_v46 = vmul.f32 %v1886_v21, %v1886_v21  ;;  %2101 = vpow2.f32 %v1290_v28  ;;  %v1315_v37 = vadd.f32 %v2088_v60, %v1314_v59  ;;  %v1352_v33 = vmul.f32 %v1887_v2, %v1887_v2  ;;  %v1903_v60 = vld [vmem:[%s2795_s19 + $0x490] sm:$0xff]  ;;  %v1906_v59 = vld [vmem:[%s2795_s19 + $0x4a8] sm:$0xff] }
 0x115   : > { %v1353_v14 = vmul.f32 %v1888_v31, %v1888_v31  ;;  %v2092_v43 = vpop.eup %2091  ;;  %v3317_v39 = vadd.f32 %v1206_v5, %v1205_v11  ;;  %v1300_v35 = vmul.f32 1.442695, %v1240_v16  ;;  %v1302_v51 = vmul.f32 1.442695, %v1241_v26  ;;  %v1898_v11 = vld [vmem:[%s2795_s19 + $0x468] sm:$0xff]  ;;  %v1904_v5 = vld [vmem:[%s2795_s19 + $0x498] sm:$0xff] }
 0x116   : > { %v1336_v19 = vadd.f32 %v2090_v34, %v1335_v3  ;;  %v2094_v58 = vpop.eup %2093  ;;  %v3321_v44 = vmul.f32 1.442695, %v1242_v36  ;;  %v3323_v40 = vmul.f32 1.442695, %v1243_v38  ;;  %v1354_v12 = vmul.f32 %v1889_v45, %v1889_v45  ;;  %v1905_v38 = vld [vmem:[%s2795_s19 + $0x4a0] sm:$0xff] }
 0x117   : > { %v1355_v53 = vmul.f32 %v1890_v8, %v1890_v8  ;;  %v1187_v30 = vrot.slane %v3313_v1, 2  ;;  %2103 = vpow2.f32 %v1292_v4  ;;  %v1356_v62 = vmul.f32 %v1891_v55, %v1891_v55 }
 0x118   : > { %v1357_v42 = vmul.f32 %v1892_v52, %v1892_v52  ;;  %2105 = vpow2.f32 %v1294_v24  ;;  %v1316_v0 = vadd.f32 %v2092_v43, %v1315_v37  ;;  %v1382_v27 = vadd.f32 %v1352_v33, %v3208_v54  ;;  %v1907_v52 = vld [vmem:[%s2795_s19 + $0x4b0] sm:$0xff]  ;;  %v1908_v37 = vld [vmem:[%s2795_s19 + $0x4b8] sm:$0xff]  ;;  %v1909_v33 = vld [vmem:[%s2795_s19 + $0x4c0] sm:$0xff] }
 0x119   : > { %v1403_v49 = vadd.f32 %v1353_v14, %v1351_v46  ;;  %v2096_v25 = vpop.eup %2095  ;;  %v1208_v20 = vrot.slane %v3317_v39, 2  ;;  %v1337_v22 = vadd.f32 %v2094_v58, %v1336_v19  ;;  %v1358_v16 = vmul.f32 %v1893_v47, %v1893_v47  ;;  %v1910_v19 = vld [vmem:[%s2795_s19 + $0x4c8] sm:$0xff]  ;;  %v1911_v58 = vld [vmem:[%s2795_s19 + $0x4d0] sm:$0xff] }
 0x11a   : > { %v1359_v15 = vmul.f32 %v1894_v10, %v1894_v10  ;;  %v2098_v9 = vpop.eup %2097  ;;  %v1360_v21 = vmul.f32 %v1895_v61, %v1895_v61  ;;  %v1361_v26 = vmul.f32 %v1896_v63, %v1896_v63  ;;  %v1383_v36 = vadd.f32 %v1382_v27, %v1354_v12  ;;  %v1913_v61 = vld [vmem:[%s2795_s19 + $0x4e0] sm:$0xff] }
 0x11b   : > { %v1404_v28 = vadd.f32 %v1403_v49, %v1355_v53  ;;  %2107 = vpow2.f32 %v1296_v48  ;;  %v1362_v54 = vmul.f32 %v1897_v32, %v1897_v32  ;;  %v1363_v2 = vmul.f32 %v1898_v11, %v1898_v11  ;;  %v1912_v53 = vld [vmem:[%s2795_s19 + $0x4d8] sm:$0xff]  ;;  %v1918_v32 = vld [vmem:[%s2795_s19 + $0x508] sm:$0xff] }
 0x11c   : > { %v1364_v31 = vmul.f32 %v1899_v57, %v1899_v57  ;;  %2109 = vpow2.f32 %v1298_v56  ;;  %v1317_v3 = vadd.f32 %v2096_v25, %v1316_v0  ;;  %v1384_v34 = vadd.f32 %v1383_v36, %v1356_v62  ;;  %v1914_v25 = vld [vmem:[%s2795_s19 + $0x4e8] sm:$0xff] }
 0x11d   : > { %v1405_v4 = vadd.f32 %v1404_v28, %v1357_v42  ;;  %v2100_v24 = vpop.eup %2099  ;;  %v1338_v45 = vadd.f32 %v2098_v9, %v1337_v22  ;;  %v1365_v8 = vmul.f32 %v1900_v50, %v1900_v50  ;;  %v1366_v46 = vmul.f32 %v1901_v6, %v1901_v6  ;;  %v1919_v22 = vld [vmem:[%s2795_s19 + $0x510] sm:$0xff]  ;;  %v1916_v50 = vld [vmem:[%s2795_s19 + $0x4f8] sm:$0xff] }
 0x11e   : > { %v1367_v48 = vmul.f32 %v1902_v18, %v1902_v18  ;;  %v2102_v55 = vpop.eup %2101  ;;  %2111 = vpow2.f32 %v1300_v35  ;;  %v3343_v14 = vmul.f32 %v1903_v60, %v1903_v60  ;;  %v1385_v56 = vadd.f32 %v1384_v34, %v1358_v16  ;;  %v1917_v35 = vld [vmem:[%s2795_s19 + $0x500] sm:$0xff]  ;;  %v1920_v6 = vld [vmem:[%s2795_s19 + $0x518] sm:$0xff]  ;;  %v1922_v60 = vld [vmem:[%s2795_s19 + $0x528] sm:$0xff] }
 0x11f   : > { %v1406_v43 = vadd.f32 %v1405_v4, %v1359_v15  ;;  %2113 = vpow2.f32 %v1302_v51  ;;  %v3347_v47 = vmul.f32 %v1904_v5, %v1904_v5  ;;  %v3349_v10 = vmul.f32 %v1905_v38, %v1905_v38  ;;  %v1921_v18 = vld [vmem:[%s2795_s19 + $0x520] sm:$0xff]  ;;  %v1923_v5 = vld [vmem:[%s2795_s19 + $0x530] sm:$0xff]  ;;  %v1924_v38 = vld [vmem:[%s2795_s19 + $0x538] sm:$0xff] }
 0x120   : > { %v3351_v12 = vmul.f32 %v1906_v59, %v1906_v59  ;;  %2115 = vpow2.f32 %v3321_v44  ;;  %v1318_v63 = vadd.f32 %v2100_v24, %v1317_v3  ;;  %v1386_v62 = vadd.f32 %v1385_v56, %v1360_v21  ;;  %v1915_v44 = vld [vmem:[%s2795_s19 + $0x4f0] sm:$0xff] }
 0x121   : > { %v1407_v42 = vadd.f32 %v1406_v43, %v1361_v26  ;;  %v2104_v51 = vpop.eup %2103  ;;  %v1339_v11 = vadd.f32 %v2102_v55, %v1338_v45  ;;  %v3358_v57 = vmul.f32 %v1907_v52, %v1907_v52  ;;  %v3360_v0 = vmul.f32 %v1908_v37, %v1908_v37  ;;  %v1925_v52 = vld [vmem:[%s2795_s19 + $0x540] sm:$0xff]  ;;  %v1926_v37 = vld [vmem:[%s2795_s19 + $0x548] sm:$0xff] }
 0x122   : > { %v3362_v27 = vmul.f32 %v1909_v33, %v1909_v33  ;;  %v2106_v49 = vpop.eup %2105  ;;  %2117 = vpow2.f32 %v3323_v40  ;;  %v3368_v16 = vmul.f32 %v1910_v19, %v1910_v19  ;;  %v1387_v15 = vadd.f32 %v1386_v62, %v1362_v54  ;;  %v1927_v19 = vld [vmem:[%s2795_s19 + $0x550] sm:$0xff]  ;;  %v1929_v62 = vld [vmem:[%s2795_s19 + $0x560] sm:$0xff] }
 0x123   : > { %v1408_v9 = vadd.f32 %v1407_v42, %v1363_v2  ;;  %v3373_v21 = vmul.f32 %v1911_v58, %v1911_v58  ;;  %v3375_v26 = vmul.f32 %v1912_v53, %v1912_v53  ;;  %v3377_v36 = vmul.f32 %v1913_v61, %v1913_v61  ;;  %v3394_v42 = vld [vmem:[%s2795_s19 + $0x568] sm:$0xff] }
 0x124   : > { %v1424_v28 = vsub.f32 0.0, %v1917_v35  ;;  %v1319_v40 = vadd.f32 %v2104_v51, %v1318_v63  ;;  %v1388_v59 = vadd.f32 %v1387_v15, %v1364_v31  ;;  %v1425_v2 = vsub.f32 0.0, %v1918_v32 }
 0x125   : > { %v1409_v54 = vadd.f32 %v1408_v9, %v1365_v8  ;;  %v2108_v3 = vpop.eup %2107  ;;  %v1340_v34 = vadd.f32 %v2106_v49, %v1339_v11  ;;  %v3382_v4 = vmul.f32 %v1914_v25, %v1914_v25  ;;  %v3384_v24 = vmul.f32 %v1915_v44, %v1915_v44  ;;  %v1928_v8 = vld [vmem:[%s2795_s19 + $0x558] sm:$0xff] }
 0x126   : > { %v1426_v45 = vsub.f32 0.0, %v1919_v22  ;;  %v2110_v55 = vpop.eup %2109  ;;  %v3388_v33 = vmul.f32 %v1916_v50, %v1916_v50  ;;  %v1389_v56 = vadd.f32 %v1388_v59, %v1366_v46  ;;  %v1427_v31 = vsub.f32 0.0, %v1920_v6  ;;  %v1933_v59 = vld [vmem:[%s2795_s19 + $0x580] sm:$0xff] }
 0x127   : > { %v1410_v43 = vadd.f32 %v1409_v54, %v1367_v48  ;;  %v1428_v58 = vsub.f32 0.0, %v1921_v18  ;;  %v1429_v53 = vsub.f32 0.0, %v1922_v60  ;;  %v1430_v61 = vsub.f32 0.0, %v1923_v5  ;;  %v1931_v60 = vld [vmem:[%s2795_s19 + $0x570] sm:$0xff]  ;;  %v1932_v5 = vld [vmem:[%s2795_s19 + $0x578] sm:$0xff] }
 0x128   : > { %v1431_v35 = vsub.f32 0.0, %v1924_v38  ;;  %v2112_v63 = vpop.eup %2111  ;;  %v1320_v51 = vadd.f32 %v2108_v3, %v1319_v40  ;;  %v1390_v32 = vadd.f32 %v1389_v56, %v3343_v14  ;;  %v1456_v11 = vmul.f32 1.442695, %v1424_v28 }
 0x129   : > { %v1458_v49 = vmul.f32 1.442695, %v1425_v2  ;;  %v2114_v46 = vpop.eup %2113  ;;  %v1341_v48 = vadd.f32 %v2110_v55, %v1340_v34  ;;  %v1411_v25 = vadd.f32 %v1410_v43, %v3347_v47  ;;  %v1432_v44 = vsub.f32 0.0, %v1925_v52  ;;  %v3403_v47 = vld [vmem:[%s2795_s19 + $0x588] sm:$0xff]  ;;  %v1935_v43 = vld [vmem:[%s2795_s19 + $0x590] sm:$0xff] }
 0x12a   : > { %v1460_v22 = vmul.f32 1.442695, %v1426_v45  ;;  %v2116_v15 = vpop.eup %2115  ;;  %v1433_v9 = vsub.f32 0.0, %v1926_v37  ;;  %v1434_v50 = vsub.f32 0.0, %v1927_v19  ;;  %v1435_v6 = vsub.f32 0.0, %v1928_v8 }
 0x12b   : > { %v1462_v18 = vmul.f32 1.442695, %v1427_v31  ;;  %v1436_v38 = vsub.f32 0.0, %v1929_v62  ;;  %v1437_v14 = vsub.f32 0.0, %v3394_v42  ;;  %2119 = vpow2.f32 %v1456_v11  ;;  %v1936_v31 = vld [vmem:[%s2795_s19 + $0x598] sm:$0xff] }
 0x12c   : > { %v1464_v28 = vmul.f32 1.442695, %v1428_v58  ;;  %v2118_v40 = vpop.eup %2117  ;;  %v1321_v54 = vadd.f32 %v2112_v63, %v1320_v51  ;;  %v1391_v2 = vadd.f32 %v1390_v32, %v3349_v10  ;;  %2121 = vpow2.f32 %v1458_v49  ;;  %v3411_v58 = vld [vmem:[%s2795_s19 + $0x5a0] sm:$0xff]  ;;  %v1939_v49 = vld [vmem:[%s2795_s19 + $0x5b0] sm:$0xff] }
 0x12d   : > { %v1466_v3 = vmul.f32 1.442695, %v1429_v53  ;;  %v1342_v34 = vadd.f32 %v2114_v46, %v1341_v48  ;;  %v1412_v45 = vadd.f32 %v1411_v25, %v3351_v12  ;;  %2123 = vpow2.f32 %v1460_v22  ;;  %v3414_v53 = vld [vmem:[%s2795_s19 + $0x5a8] sm:$0xff]  ;;  %v3422_v46 = vld [vmem:[%s2795_s19 + $0x5b8] sm:$0xff] }
 0x12e   : > { %v1468_v55 = vmul.f32 1.442695, %v1430_v61  ;;  %v1438_v52 = vsub.f32 0.0, %v1931_v60  ;;  %v1439_v37 = vsub.f32 0.0, %v1932_v5  ;;  %2125 = vpow2.f32 %v1462_v18  ;;  %v3430_v22 = vld [vmem:[%s2795_s19 + $0x5c8] sm:$0xff] }
 0x12f   : > { %v1470_v56 = vmul.f32 1.442695, %v1431_v35  ;;  %v1440_v19 = vsub.f32 0.0, %v1933_v59  ;;  %v1441_v8 = vsub.f32 0.0, %v3403_v47  ;;  %2127 = vpow2.f32 %v1464_v28 }
 0x130   : > { %v1472_v10 = vmul.f32 1.442695, %v1432_v44  ;;  %v1322_v12 = vadd.f32 %v2116_v15, %v1321_v54  ;;  %v1392_v61 = vadd.f32 %v1391_v2, %v3358_v57  ;;  %2129 = vpow2.f32 %v1466_v3  ;;  %v3427_v44 = vld [vmem:[%s2795_s19 + $0x5c0] sm:$0xff] }
 0x131   : > { %v1474_v63 = vmul.f32 1.442695, %v1433_v9  ;;  %v3417_v35 = vadd.f32 %v2118_v40, %v1342_v34  ;;  %v1413_v62 = vadd.f32 %v1412_v45, %v3360_v0  ;;  %2131 = vpow2.f32 %v1468_v55  ;;  %v1945_v3 = vld [vmem:[%s2795_s19 + $0x5e0] sm:$0xff] }
 0x132   : > { %v1476_v42 = vmul.f32 1.442695, %v1434_v50  ;;  %v1442_v51 = vsub.f32 0.0, %v1935_v43  ;;  %v1443_v32 = vsub.f32 0.0, %v1936_v31  ;;  %2133 = vpow2.f32 %v1470_v56 }
 0x133   : > { %v1478_v11 = vmul.f32 1.442695, %v1435_v6  ;;  %v1444_v48 = vsub.f32 0.0, %v3411_v58  ;;  %v1445_v57 = vsub.f32 0.0, %v3414_v53  ;;  %2135 = vpow2.f32 %v1472_v10 }
 0x134   : > { %v1480_v25 = vmul.f32 1.442695, %v1436_v38  ;;  %v1323_v0 = vrot.slane %v1322_v12, 4  ;;  %v1393_v15 = vadd.f32 %v1392_v61, %v3362_v27  ;;  %2137 = vpow2.f32 %v1474_v63  ;;  %v3436_v38 = vld [vmem:[%s2795_s19 + $0x5d0] sm:$0xff]  ;;  %v1944_v27 = vld [vmem:[%s2795_s19 + $0x5d8] sm:$0xff] }
 0x135   : > { %v1482_v9 = vmul.f32 1.442695, %v1437_v14  ;;  %v2120_v50 = vpop.eup %2119  ;;  %v1344_v6 = vrot.slane %v3417_v35, 4  ;;  %v1414_v18 = vadd.f32 %v1413_v62, %v3368_v16  ;;  %2139 = vpow2.f32 %v1476_v42  ;;  %v1947_v62 = vld [vmem:[%s2795_s19 + $0x5f0] sm:$0xff] }
 0x136   : > { %v1484_v60 = vmul.f32 1.442695, %v1438_v52  ;;  %v2122_v5 = vpop.eup %2121  ;;  %v1446_v28 = vsub.f32 0.0, %v1939_v49  ;;  %v1447_v40 = vsub.f32 0.0, %v3422_v46  ;;  %2141 = vpow2.f32 %v1478_v11 }
 0x137   : > { %v1486_v59 = vmul.f32 1.442695, %v1439_v37  ;;  %v2124_v47 = vpop.eup %2123  ;;  %v1448_v14 = vsub.f32 0.0, %v3427_v44  ;;  %v1449_v54 = vsub.f32 0.0, %v3430_v22  ;;  %2143 = vpow2.f32 %v1480_v25 }
 0x138   : > { %v1488_v2 = vmul.f32 1.442695, %v1440_v19  ;;  %v2126_v16 = vpop.eup %2125  ;;  %v3443_v34 = vadd.f32 %v1323_v0, %v1322_v12  ;;  %v1394_v45 = vadd.f32 %v1393_v15, %v3373_v21  ;;  %2145 = vpow2.f32 %v1482_v9  ;;  %v1946_v12 = vld [vmem:[%s2795_s19 + $0x5e8] sm:$0xff]  ;;  %v1948_v15 = vld [vmem:[%s2795_s19 + $0x5f8] sm:$0xff]  ;;  %s2300_s19 = smov [#allocation7]  }
 0x139   : > { %v1490_v55 = vmul.f32 1.442695, %v1441_v8  ;;  %v2128_v52 = vpop.eup %2127  ;;  %v1415_v37 = vadd.f32 %v1414_v18, %v3375_v26  ;;  %v1450_v56 = vsub.f32 0.0, %v3436_v38  ;;  %2147 = vpow2.f32 %v1484_v60 }
 0x13a   : > { %v1492_v43 = vmul.f32 1.442695, %v1442_v51  ;;  %v2130_v31 = vpop.eup %2129  ;;  %v1451_v10 = vsub.f32 0.0, %v1944_v27  ;;  %2149 = vpow2.f32 %v1486_v59  ;;  %v1494_v19 = vmul.f32 1.442695, %v1443_v32 }
 0x13b   : > { %v1520_v58 = vadd.f32 %v2124_v47, %v2120_v50  ;;  %v2132_v53 = vpop.eup %2131  ;;  %v1452_v61 = vsub.f32 0.0, %v1945_v3  ;;  %2151 = vpow2.f32 %v1488_v2  ;;  %v1496_v21 = vmul.f32 1.442695, %v1444_v48 }
 0x13c   : > { %v1541_v63 = vadd.f32 %v2126_v16, %v2122_v5  ;;  %v2134_v8 = vpop.eup %2133  ;;  %v1395_v26 = vadd.f32 %v1394_v45, %v3377_v36  ;;  %2153 = vpow2.f32 %v1490_v55  ;;  %v1498_v42 = vmul.f32 1.442695, %v1445_v57 }
 0x13d   : > { %v1521_v11 = vadd.f32 %v2128_v52, %v1520_v58  ;;  %v2136_v51 = vpop.eup %2135  ;;  %v1416_v49 = vadd.f32 %v1415_v37, %v3382_v4  ;;  %2155 = vpow2.f32 %v1492_v43  ;;  %v1500_v32 = vmul.f32 1.442695, %v1446_v28 }
 0x13e   : > { %v1542_v46 = vadd.f32 %v2130_v31, %v1541_v63  ;;  %v2138_v25 = vpop.eup %2137  ;;  %v1453_v44 = vsub.f32 0.0, %v1946_v12  ;;  %2157 = vpow2.f32 %v1494_v19  ;;  %v1502_v22 = vmul.f32 1.442695, %v1447_v40 }
 0x13f   : > { %v1522_v48 = vadd.f32 %v2132_v53, %v1521_v11  ;;  %v2140_v0 = vpop.eup %2139  ;;  %v1454_v9 = vsub.f32 0.0, %v1947_v62  ;;  %2159 = vpow2.f32 %v1496_v21  ;;  %v1504_v50 = vmul.f32 1.442695, %v1448_v14 }
 0x140   : > { %v1543_v36 = vadd.f32 %v2134_v8, %v1542_v46  ;;  %v2142_v18 = vpop.eup %2141  ;;  %v1396_v57 = vadd.f32 %v1395_v26, %v3384_v24  ;;  %2161 = vpow2.f32 %v1498_v42  ;;  %v1506_v60 = vmul.f32 1.442695, %v1449_v54 }
 0x141   : > { %v1523_v4 = vadd.f32 %v2136_v51, %v1522_v48  ;;  %v2144_v5 = vpop.eup %2143  ;;  %v1417_v38 = vadd.f32 %v1416_v49, %v3388_v33  ;;  %2163 = vpow2.f32 %v1500_v32  ;;  %v1508_v28 = vmul.f32 1.442695, %v1450_v56 }
 0x142   : > { %v1544_v59 = vadd.f32 %v2138_v25, %v1543_v36  ;;  %v2146_v40 = vpop.eup %2145  ;;  %v1455_v47 = vsub.f32 0.0, %v1948_v15  ;;  %2165 = vpow2.f32 %v1502_v22  ;;  %v1510_v27 = vmul.f32 1.442695, %v1451_v10 }
 0x143   : > { %v1524_v2 = vadd.f32 %v2140_v0, %v1523_v4  ;;  %v2148_v16 = vpop.eup %2147  ;;  %v1345_v14 = vadd.f32 %v1344_v6, %v3417_v35  ;;  %2167 = vpow2.f32 %v1504_v50  ;;  %v1512_v24 = vmul.f32 1.442695, %v1452_v61 }
 0x144   : > { %v1545_v54 = vadd.f32 %v2142_v18, %v1544_v59  ;;  %v2150_v3 = vpop.eup %2149  ;;  %v1397_v45 = vrot.slane %v1396_v57, 4  ;;  %2169 = vpow2.f32 %v1506_v60  ;;  %v1514_v33 = vmul.f32 1.442695, %v1453_v44 }
 0x145   : > { %v1525_v55 = vadd.f32 %v2144_v5, %v1524_v2  ;;  %v2152_v52 = vpop.eup %2151  ;;  %v1418_v37 = vrot.slane %v1417_v38, 4  ;;  %2171 = vpow2.f32 %v1508_v28  ;;  %v1516_v56 = vmul.f32 1.442695, %v1454_v9 }
 0x146   : > { %v1546_v43 = vadd.f32 %v2146_v40, %v1545_v54  ;;  %v2154_v31 = vpop.eup %2153  ;;  %v1103_v10 = vadd.f32 %v1102_v29, %v3293_v7  ;;  %2173 = vpow2.f32 %v1510_v27  ;;  %v1518_v35 = vmul.f32 1.442695, %v1455_v47 }
 0x147   : > { %v1526_v6 = vadd.f32 %v2148_v16, %v1525_v55  ;;  %v2156_v19 = vpop.eup %2155  ;;  %v1188_v58 = vadd.f32 %v1187_v30, %v3313_v1  ;;  %v1209_v53 = vadd.f32 %v1208_v20, %v3317_v39  ;;  %2175 = vpow2.f32 %v1512_v24 }
 0x148   : > { %v1547_v12 = vadd.f32 %v2150_v3, %v1546_v43  ;;  %v2158_v61 = vpop.eup %2157  ;;  %v1325_v7 = vrot.slane %v3443_v34, 2  ;;  %v1346_v29 = vrot.slane %v1345_v14, 2  ;;  %2177 = vpow2.f32 %v1514_v33 }
 0x149   : > { %v1527_v21 = vadd.f32 %v2152_v52, %v1526_v6  ;;  %v2160_v63 = vpop.eup %2159  ;;  %v1398_v8 = vadd.f32 %v1397_v45, %v1396_v57  ;;  %v1419_v62 = vadd.f32 %v1418_v37, %v1417_v38  ;;  %2179 = vpow2.f32 %v1516_v56 }
 0x14a   : > { %v1548_v1 = vadd.f32 %v2154_v31, %v1547_v12  ;;  %v2162_v30 = vpop.eup %2161  ;;  %v868_v39 = vrot.slane %v3137_v17, 1  ;;  %v1083_v20 = vrot.slane %v3309_v23, 1  ;;  %2181 = vpow2.f32 %v1518_v35 }
 0x14b   : > { %v1528_v26 = vadd.f32 %v2156_v19, %v1527_v21  ;;  %v2164_v42 = vpop.eup %2163  ;;  %v1104_v11 = vrot.slane %v1103_v10, 1  ;;  %v1189_v32 = vrot.slane %v1188_v58, 1  ;;  %v1326_v46 = vadd.f32 %v1325_v7, %v3443_v34 }
 0x14c   : > { %v1549_v51 = vadd.f32 %v2158_v61, %v1548_v1  ;;  %v2166_v49 = vpop.eup %2165  ;;  %v1347_v25 = vadd.f32 %v1346_v29, %v1345_v14  ;;  %v1210_v48 = vrot.slane %v1209_v53, 1  ;;  %v1399_v0 = vrot.slane %v1398_v8, 2 }
 0x14d   : > { %v1529_v44 = vadd.f32 %v2160_v63, %v1528_v26  ;;  %v2168_v22 = vpop.eup %2167  ;;  %v1420_v15 = vrot.slane %v1419_v62, 2  ;;  %v848_v36 = vadd.f32 %v847_v41, %v3132_v13  ;;  %v869_v18 = vadd.f32 %v868_v39, %v3137_v17 }
 0x14e   : > { %v1550_v9 = vadd.f32 %v2162_v30, %v1549_v51  ;;  %v2170_v50 = vpop.eup %2169  ;;  %v1084_v57 = vadd.f32 %v1083_v20, %v3309_v23  ;;  %v1105_v4 = vadd.f32 %v1104_v11, %v1103_v10  ;;  %v1580_v38 = vstv %s3467_s20  ;;  %s2202_s20 = sshll.u32 %s2300_s19, 4  ;;  %s2203_s20 = int_to_ptr.vmem [resolvable:$false] %s2202_s20 }
 0x14f   : > { %v1530_v60 = vadd.f32 %v2164_v42, %v1529_v44  ;;  %v2172_v34 = vpop.eup %2171  ;;  %v1584_v28 = vstv %s3469_s22  ;;  %v1190_v40 = vadd.f32 %v1189_v32, %v1188_v58  ;;  %v1327_v47 = vrot.slane %v1326_v46, 1  ;;  %s2204_s22 = scalar_lea.vmem %s2203_s20, 512  ;;  %p2205_p13 = scmp.lt.s32.totalorder %s3509_s5, %s2203_s20 }
 0x150   : > { %v1551_v5 = vadd.f32 %v2166_v49, %v1550_v9  ;;  %v2174_v59 = vpop.eup %2173  ;;  %v1348_v27 = vrot.slane %v1347_v25, 1  ;;  %v1211_v13 = vadd.f32 %v1210_v48, %v1209_v53  ;;  %v1400_v41 = vadd.f32 %v1399_v0, %v1398_v8  ;;  %p2206_p0 = scmp.lt.s32.totalorder %s2204_s22, %s2198_s17 }
 0x151   : > { %v1531_v2 = vadd.f32 %v2168_v22, %v1530_v60  ;;  %v2176_v16 = vpop.eup %2175  ;;  %v1421_v17 = vadd.f32 %v1420_v15, %v1419_v62  ;;  %v1581_v54 = vmul.f32 %v1580_v38, %v848_v36  ;;  %v1585_v3 = vmul.f32 %v1584_v28, %v1084_v57 }
 0x152   : > { %v1552_v14 = vadd.f32 %v2170_v50, %v1551_v5  ;;  %v2178_v23 = vpop.eup %2177  ;;  %v1582_v55 = vmul.f32 %v1580_v38, %v869_v18  ;;  %v1586_v52 = vmul.f32 %v1584_v28, %v1105_v4  ;;  %v1590_v37 = vstv %s3474_s25  ;;  %p2207_p1 = por %p2206_p0, %p2205_p13 }
 0x153   : > { %v1532_v24 = vadd.f32 %v2172_v34, %v1531_v2  ;;  %v2180_v45 = vpop.eup %2179  ;;  %v1328_v43 = vadd.f32 %v1327_v47, %v1326_v46  ;;  %v1349_v31 = vadd.f32 %v1348_v27, %v1347_v25  ;;  %v1401_v35 = vrot.slane %v1400_v41, 1 }
 0x154   : > { %v1553_v33 = vadd.f32 %v2174_v59, %v1552_v14  ;;  %v2182_v56 = vpop.eup %2181  ;;  %v1422_v6 = vrot.slane %v1421_v17, 1  ;;  %v1563_v58 = vsel %vm1562_vm2, %v848_v36, %v1084_v57  ;;  %v1564_v12 = vsel %vm1562_vm2, %v869_v18, %v1105_v4  ;;  %p2208_p2 = pnand %p2207_p1, %p2201_p12 }
 0x155   : > { %v1533_v10 = vadd.f32 %v2176_v16, %v1532_v24  ;;  %v1587_v61 = vadd.f32 %v1585_v3, %v1581_v54  ;;  %v1591_v7 = vmul.f32 %v1590_v37, %v1190_v40  ;;  %v1588_v21 = vadd.f32 %v1586_v52, %v1582_v55  ;;  %v3649_v54 = vld [vmem:[#allocation12_spill] sm:$0xff] }
 0x156   : > { %v1554_v19 = vadd.f32 %v2178_v23, %v1553_v33  ;;  %v1592_v63 = vmul.f32 %v1590_v37, %v1211_v13  ;;  %v1596_v8 = vstv %s3484_s26  ;;  %v1566_v1 = vsel %vm1565_vm3, %v1563_v58, %v1190_v40 }
 0x157   : > { %v1534_v53 = vadd.f32 %v2180_v45, %v1533_v10  ;;  %v1402_v30 = vadd.f32 %v1401_v35, %v1400_v41  ;;  %v1423_v39 = vadd.f32 %v1422_v6, %v1421_v17  ;;  %v1567_v26 = vsel %vm1565_vm3, %v1564_v12, %v1211_v13 }
 0x158   : > { %v1555_v29 = vadd.f32 %v2182_v56, %v1554_v19  ;;  %v1593_v11 = vadd.f32 %v1591_v7, %v1587_v61  ;;  %v1597_v51 = vmul.f32 %v1596_v8, %v1328_v43  ;;  %v1594_v32 = vadd.f32 %v1592_v63, %v1588_v21 }
 0x159   : > { %v1535_v62 = vrot.slane %v1534_v53, 4  ;;  %v1598_v46 = vmul.f32 %v1596_v8, %v1349_v31  ;;  %v1602_v25 = vstv %s3487_s27  ;;  %v1569_v48 = vsel %vm1568_vm4, %v1566_v1, %v1328_v43 }
 0x15a   : > { %v1556_v20 = vrot.slane %v1555_v29, 4  ;;  %v1570_v15 = vsel %vm1568_vm4, %v1567_v26, %v1349_v31  ;;  %v1599_v9 = vadd.f32 %v1597_v51, %v1593_v11  ;;  %v1603_v50 = vmul.f32 %v1602_v25, %v1402_v30 }
 0x15b   : > { %v1536_v42 = vadd.f32 %v1535_v62, %v1534_v53  ;;  %v1600_v18 = vadd.f32 %v1598_v46, %v1594_v32  ;;  %v1604_v57 = vmul.f32 %v1602_v25, %v1423_v39  ;;  %v2299_v60 = vmov 1966171168  }
 0x15c   : > { %v1557_v49 = vadd.f32 %v1556_v20, %v1555_v29  ;;  %v1617_v34 = vunpack.c.l.s4 %v2299_v60  ;;  %v1572_v38 = vsel %vm1571_vm5, %v1569_v48, %v1402_v30  ;;  %v1608_v28 = vstv %s3494_s28 }
 0x15d   : > { %v1537_v44 = vrot.slane %v1536_v42, 2  ;;  %v1573_v40 = vsel %vm1571_vm5, %v1570_v15, %v1423_v39  ;;  %v1605_v47 = vadd.f32 %v1603_v50, %v1599_v9  ;;  %v1606_v2 = vadd.f32 %v1604_v57, %v1600_v18 }
 0x15e   : > { %v1558_v22 = vrot.slane %v1557_v49, 2  ;;  %v1618_v16 = vunpack.c.0.s8 %v1617_v34 }
 0x15f   : > { %v1538_v0 = vadd.f32 %v1537_v44, %v1536_v42 }
 0x160   : > { %v1559_v36 = vadd.f32 %v1558_v22, %v1557_v49  ;;  %v1621_v3 = vsub.s32 %v1618_v16, %v3649_v54 }
 0x161   : > { %v1539_v4 = vrot.slane %v1538_v0, 1 }
 0x162   : > { %v1560_v5 = vrot.slane %v1559_v36, 1 }
 0x163   : > { %v1540_v59 = vadd.f32 %v1539_v4, %v1538_v0 }
 0x164   : > { %v1561_v27 = vadd.f32 %v1560_v5, %v1559_v36 }
 0x165   : > { %v1575_v13 = vsel %vm1574_vm6, %v1572_v38, %v1540_v59  ;;  %v1609_v41 = vmul.f32 %v1608_v28, %v1540_v59 }
 0x166   : > { %v1576_v17 = vsel %vm1574_vm6, %v1573_v40, %v1561_v27  ;;  %1577 = vst [vmem:[%s595_s4] sm:$0x3f] %v1575_v13  ;;  %v1610_v14 = vmul.f32 %v1608_v28, %v1561_v27 }
 0x167   : > { %1578 = vst [vmem:[%s595_s4 + $0x8] sm:$0x3f] %v1576_v17  ;;  %v1611_v23 = vadd.f32 %v1609_v41, %v1605_v47 }
 0x168   : > { %v1612_v24 = vadd.f32 %v1610_v14, %v1606_v2 }
 0x169   : > { %2211 = shalt.err (!%p2208_p2)
}
 0x16a   : > { %s2212_s25 = scalar_lea.hbm %s3507_s9, 256  ;;  %s2216_s28 = scalar_lea.hbm %s3589_s3, 512 }
 0x16b   : > { %p2213_p3 = scmp.ne.s32.totalorder %s3507_s9, %s2212_s25  ;;  %p2217_p8 = scmp.lt.u32.totalorder %s3507_s9, %s3589_s3 }
 0x16c   : > { %p2218_p9 = scmp.lt.u32.totalorder %s2216_s28, %s2212_s25  ;;  %p2220_p11 = scmp.lt.u32.totalorder %s2212_s25, %s3507_s9 }
 0x16d   : > { %p2214_p4 = pnand %p2213_p3, %p3650_p10 }
 0x16e   : > { %p2219_p5 = por %p2218_p9, %p2217_p8 }
 0x16f   : > { %p2215_p7 = pneg %p2214_p4 }
 0x170   : > { %p2221_p12 = por %p2220_p11, %p2219_p5 }
 0x172   : > { %p2222_p13 = pnand %p2221_p12, %p2215_p7 }
 0x174   : > { %2225 = shalt.err (!%p2222_p13)
}
 0x175   : > { %2004 = dma.vmem_to_hbm [thread:$0]  (%p3650_p10), %s3509_s5, 256, %s3507_s9, %s1642_s10   ;;  %v1615_v45 = vcombine.low %v1611_v23, %v1612_v24  ;;  %v3651_v55 = vlaneseq }
 0x176   : > { %s1995_s4 = sshll.u32 %s2343_s16, 5  ;;  %s588_s7 = scalar_lea.vmem [#allocation6], %s1787_s6 }
 0x177   : > { %s1656_s8 = sshll.u32 %s588_s7, 4  ;;  %v1622_v33 = vrot.slane %v1615_v45, %v1621_v3  ;;  %vm1633_vm7 = vcmp.lt.s32.totalorder %v3651_v55, 256  ;;  %s3542_s20 = scalar_lea.hbm %s3588_s2, %s1995_s4  ;;  %s3544_s8 = int_to_ptr.vmem [resolvable:$true] %s1656_s8 }
 0x178   : > { %s1637_s5 = scalar_lea.sflag [#allocation3], %s2792_s11  ;;  %s2226_s16 = scalar_lea.vmem %s3544_s8, 32 }
 0x179   : > { %v1629_v52 = vrot.slane %v1622_v33, %v1621_v3  ;;  %p2227_p0 = scmp.ne.s32.totalorder %s3544_s8, %s2226_s16  ;;  %s2301_s6 = smov [#allocation6]  }
 0x17a   : > { %s2230_s9 = sshll.u32 %s2301_s6, 4  ;;  %s2231_s9 = int_to_ptr.vmem [resolvable:$false] %s2230_s9 }
 0x17b   : > { %1635 = vst.msk [vmem:[%s588_s7] sm:$0x3] %vm1633_vm7, %v1629_v52  ;;  %p2228_p1 = pnand %p2227_p0, %p3650_p10  ;;  %s2232_s10 = scalar_lea.vmem %s2231_s9, 64 }
 0x17c   : > { %p2233_p3 = scmp.lt.s32.totalorder %s3544_s8, %s2231_s9  ;;  %p2234_p4 = scmp.lt.s32.totalorder %s2232_s10, %s2226_s16 }
 0x17d   : > { %p2229_p2 = pneg %p2228_p1 }
 0x17e   : > { %p2235_p7 = por %p2234_p4, %p2233_p3 }
 0x180   : > { %p2236_p8 = pnand %p2235_p7, %p2229_p2 }
 0x182   : > { %2239 = shalt.err (!%p2236_p8)
}
 0x183   : > { %s2240_s11 = scalar_lea.hbm %s3542_s20, 32  ;;  %s2244_s26 = scalar_lea.hbm %s3588_s2, 64 }
 0x184   : > { %p2241_p9 = scmp.ne.s32.totalorder %s3542_s20, %s2240_s11  ;;  %p2245_p12 = scmp.lt.u32.totalorder %s3542_s20, %s3588_s2 }
 0x185   : > { %p2246_p13 = scmp.lt.u32.totalorder %s2244_s26, %s2240_s11  ;;  %p2248_p1 = scmp.lt.u32.totalorder %s2240_s11, %s3542_s20 }
 0x186   : > { %p2242_p5 = pnand %p2241_p9, %p3650_p10 }
 0x187   : > { %p2247_p0 = por %p2246_p13, %p2245_p12 }
 0x188   : > { %p2243_p11 = pneg %p2242_p5 }
 0x189   : > { %p2249_p2 = por %p2248_p1, %p2247_p0 }
 0x18b   : > { %p2250_p3 = pnand %p2249_p2, %p2243_p11 }
 0x18d   : > { %2253 = shalt.err (!%p2250_p3)
}
 0x18e   : > { %2003 = dma.vmem_to_hbm [thread:$0]  (%p3650_p10), %s3544_s8, 32, %s3542_s20, %s1637_s5  }
 0x18f PF: > { %s1682_s29 = sand.u32 1, %s2284_s12   ;;  %p3652_p4 = scmp.ne.s32.totalorder %s3601_s24, 0 }
 0x190   : > { %s1683_s30 = scalar_lea.sflag [#allocation3], %s1682_s29 }
 0x191   : > { %p2012_p7 = pnand %p1782_p6, %p3652_p4 }
 0x193   : > { %2275 = dma.done.wait (!%p2012_p7), %s1683_s30, 32  }
 0x194   : > { %2277 = vsyncadd (!%p2012_p7), %s1683_s30, 4294967264  ;;  %s1692_s4 = scalar_lea.sflag [#allocation8], %s1682_s29 }
 0x195   : > { %2279 = dma.done.wait (!%p2012_p7), %s1692_s4, 256  }
 0x196   : > { %2281 = vsyncadd (!%p2012_p7), %s1692_s4, 4294967040  ;;  %p18_p10 = scmp.ge.s32.totalorder %s2347_s18, 4   ;;  %s3653_s12 = smov %s2288_s13 }
 0x197   : > { %s3654_s13 = smov %s2292_s14  ;;  %s3655_s14 = smov %s2359_s21 }
 0x198   : > { %s3656_s15 = smov %s2347_s18  ;;  %20 = sbr.rel (!%p18_p10) target bundleno = 6 (0x6), region = 118 }
 0x19f   :  { %1697 = vsyncpa [#allocation3], 1 }
 0x1a0   :  { %1699 = vsyncpa [#allocation3 + $0x1], 1 }
 0x1a1   :  { %1700 = vsyncpa [#allocation8], 1 }
 0x1a2   :  { %1702 = vsyncpa [#allocation8 + $0x1], 1 }
 0x1a3   :  { %1703 = vsyncpa [#allocation4], 1 }
 0x1a4   :  { %1705 = vsyncpa [#allocation4 + $0x1], 1 }

</bundles_post_ra>
